<compile_context>
chip_gen: v6e
topology: v6e:2x2x1
jax: 0.10.0
libtpu: 0.0.40
codegen_flags: <defaults>
</compile_context>

<pallas_src>
import functools

import jax
import jax.numpy as jnp
from jax.experimental import pallas as pl
from jax.experimental.pallas import tpu as pltpu


def voxels_kernel(xyz_ref, table_ref, out_ref, *, nb_voxels, scale):
    V = nb_voxels
    V2 = V * V

    xyz = xyz_ref[...]                                   # (3, TN) f32
    tn = xyz.shape[1]

    half = scale / 2.0
    inv_step = float(V) / float(scale)                   # multiply instead of divide

    # In-box mask: max(|coord|) < half.  (1, TN) bool
    cond = jnp.max(jnp.abs(xyz), axis=0, keepdims=True) < half

    # Voxel indices (truncation toward zero, matching torch .type(torch.long) for
    # the in-box points, which are always >= 0).  Clip only matters outside the box.
    idx = jnp.clip((xyz * inv_step + V / 2.0).astype(jnp.int32), 0, V - 1)   # (3, TN)
    ix = idx[0:1, :]
    iy = idx[1:2, :]
    iz = idx[2:3, :]
    flat_xy = ix * V + iy                                # (1, TN) in [0, V^2)

    # Factored gather, stage 1 (MXU, native bf16 path):
    # one-hot over (ix, iy) — 0.0 / 1.0 are exact in bf16.
    rows = jax.lax.broadcasted_iota(jnp.int32, (V2, tn), 0)
    onehot_xy = (rows == flat_xy).astype(jnp.bfloat16)   # (V^2, TN) bf16

    # (8V, V^2) bf16 @ (V^2, TN) bf16 -> (8V, TN) f32.
    # Rows [0, 4V) hold the bf16 hi part of the f32 table, rows [4V, 8V) the bf16
    # residual (lo).  hi + lo reconstructs f32 table values to ~1e-5 abs.
    g = jnp.dot(table_ref[...], onehot_xy, preferred_element_type=jnp.float32)
    gathered = g[: 4 * V, :] + g[4 * V:, :]              # (4V, TN), row = c*V + iz

    # Stage 2: z-selection, fused — one mask, one select, one sublane reduction.
    zmask = jax.lax.broadcasted_iota(jnp.int32, (V, tn), 0) == iz            # (V, TN)
    g3 = gathered.reshape(4, V, tn)                      # 16-row slabs, tile-aligned
    cd = jnp.sum(jnp.where(zmask[None, :, :], g3, 0.0), axis=1)              # (4, TN)

    # Zero points outside the box, then sigmoid on rows 0..2 / relu on row 3 with a
    # single row-masked select and one full lane-dense store.
    cd = jnp.where(cond, cd, 0.0)
    row_ids = jax.lax.broadcasted_iota(jnp.int32, (4, tn), 0)
    out_ref[...] = jnp.where(row_ids < 3, jax.nn.sigmoid(cd), jnp.maximum(cd, 0.0))


def prepare_voxel_table(voxels, nb_voxels):
    """Call-invariant relayout of the (V, V, V, 4) parameter (hoisted out of forward).

    Returns an (8*V, V*V) bf16 table:
      rows [0, 4V)  : bf16 hi part,  row = c*V + iz, col = ix*V + iy
      rows [4V, 8V) : bf16 residual (f32 table - hi), same indexing.
    """
    V = nb_voxels
    t = jnp.transpose(voxels.astype(jnp.float32), (3, 2, 0, 1)).reshape(4 * V, V * V)
    hi = t.astype(jnp.bfloat16)
    lo = (t - hi.astype(jnp.float32)).astype(jnp.bfloat16)
    return jnp.concatenate([hi, lo], axis=0)             # (8V, V^2) bf16


def voxels_forward(xyz, d, table, *, nb_voxels, scale, tile=1024):
    """xyz: (N, 3) f32; d unused (matches the PyTorch forward signature);
    table: output of prepare_voxel_table().  Returns (rgb (N,3), sigma (N,1))."""
    del d  # unused by the reference module's forward
    n = xyz.shape[0]
    V = nb_voxels
    n_pad = pl.cdiv(n, tile) * tile

    # Lane-dense point layout; pad of the transposed array (no zeros+scatter).
    xyz_t = jnp.pad(xyz.T.astype(jnp.float32), ((0, 0), (0, n_pad - n)))

    kern = functools.partial(voxels_kernel, nb_voxels=V, scale=float(scale))
    out_t = pl.pallas_call(
        kern,
        out_shape=jax.ShapeDtypeStruct((4, n_pad), jnp.float32),
        grid=(n_pad // tile,),
        in_specs=[
            pl.BlockSpec((3, tile), lambda i: (0, i)),         # per-tile point coords
            pl.BlockSpec((8 * V, V * V), lambda i: (0, 0)),    # bf16 table, VMEM-resident
        ],
        out_specs=pl.BlockSpec((4, tile), lambda i: (0, i)),
        compiler_params=pltpu.CompilerParams(
            dimension_semantics=("parallel",),
        ),
    )(xyz_t, table)

    # TODO(synk): consumers that can take the lane-dense (4, N) slab directly should use
    # out_t and skip this transpose (saves one extra HBM read+write pass for large N).
    cd = out_t[:, :n].T                                        # (N, 4), already activated
    return cd[:, :3], cd[:, 3:4]


def voxels_reference(xyz, voxels, *, nb_voxels, scale):
    x, y, z = xyz[:, 0], xyz[:, 1], xyz[:, 2]
    half = scale / 2.0
    cond = (jnp.abs(x) < half) & (jnp.abs(y) < half) & (jnp.abs(z) < half)
    step = scale / nb_voxels

    def to_idx(c):
        i = (c / step + nb_voxels / 2.0).astype(jnp.int32)
        return jnp.clip(jnp.where(cond, i, 0), 0, nb_voxels - 1)

    ix, iy, iz = to_idx(x), to_idx(y), to_idx(z)
    vals = voxels[ix, iy, iz]                                  # (N, 4)
    cd = jnp.where(cond[:, None], vals, 0.0)
    return jax.nn.sigmoid(cd[:, :3]), jnp.maximum(cd[:, 3:4], 0.0)


if __name__ == "__main__":
    nb_voxels = 16
    scale = 1.0
    tile = 1024
    n_points = 8192   # grid = 8 steps at tile=1024: keeps both v7x TensorCores busy

    key = jax.random.PRNGKey(0)
    k_vox, k_xyz, k_d = jax.random.split(key, 3)

    # Deterministic "parameter" init (torch.rand -> uniform [0, 1))
    voxels = jax.random.uniform(k_vox, (nb_voxels, nb_voxels, nb_voxels, 4), jnp.float32)
    # Points both inside and outside the [-0.5, 0.5]^3 box
    xyz = jax.random.uniform(k_xyz, (n_points, 3), jnp.float32, minval=-0.6, maxval=0.6)
    d = jax.random.uniform(k_d, (n_points, 3), jnp.float32)  # unused, signature parity

    table = prepare_voxel_table(voxels, nb_voxels)            # hoisted, call-invariant
    rgb, sigma = voxels_forward(xyz, d, table,
                                nb_voxels=nb_voxels, scale=scale, tile=tile)
    jax.block_until_ready((rgb, sigma))

    rgb_ref, sigma_ref = voxels_reference(xyz, voxels, nb_voxels=nb_voxels, scale=scale)
    assert rgb.shape == (n_points, 3) and sigma.shape == (n_points, 1)
    assert jnp.allclose(rgb, rgb_ref, atol=1e-4), "rgb mismatch vs reference"
    assert jnp.allclose(sigma, sigma_ref, atol=1e-4), "sigma mismatch vs reference"

    print("KERNEL_OK")
</pallas_src>

<mosaic_0001>
module attributes {stable_mosaic.version = 11 : i64} {
  func.func @voxels_kernel(%arg0: i32, %arg1: memref<3x1024xf32, #tpu.memory_space<vmem>>, %arg2: memref<128x256xbf16, #tpu.memory_space<vmem>>, %arg3: memref<4x1024xf32, #tpu.memory_space<vmem>>) attributes {dimension_semantics = [#tpu.dimension_semantics<parallel>], iteration_bounds = array<i64: 8>, scalar_prefetch = 0 : i64, scratch_operands = 0 : i64, tpu.core_type = #tpu.core_type<tc>, window_params = [{transform_indices = @transform_0, window_bounds = array<i64: 3, 1024>}, {pipeline_mode = #tpu.pipeline_mode<synchronous>, transform_indices = @transform_1, window_bounds = array<i64: 128, 256>}, {transform_indices = @transform_2, window_bounds = array<i64: 4, 1024>}]} {
    %c0 = arith.constant 0 : index
    %c0_0 = arith.constant 0 : index
    %0 = vector.load %arg1[%c0, %c0_0] : memref<3x1024xf32, #tpu.memory_space<vmem>>, vector<3x1024xf32>
    %1 = math.absf %0 : vector<3x1024xf32>
    %cst = arith.constant dense<0xFF800000> : vector<1024xf32>
    %2 = vector.multi_reduction <maximumf>, %1, %cst [0] : vector<3x1024xf32> to vector<1024xf32>
    %3 = vector.shape_cast %2 : vector<1024xf32> to vector<1x1024xf32>
    %cst_1 = arith.constant 5.000000e-01 : f32
    %4 = vector.broadcast %cst_1 : f32 to vector<1x1024xf32>
    %5 = arith.cmpf olt, %3, %4 : vector<1x1024xf32>
    %cst_2 = arith.constant 1.600000e+01 : f32
    %6 = vector.broadcast %cst_2 : f32 to vector<3x1024xf32>
    %7 = arith.mulf %0, %6 : vector<3x1024xf32>
    %cst_3 = arith.constant 8.000000e+00 : f32
    %8 = vector.broadcast %cst_3 : f32 to vector<3x1024xf32>
    %9 = arith.addf %7, %8 : vector<3x1024xf32>
    %10 = arith.fptosi %9 : vector<3x1024xf32> to vector<3x1024xi32>
    %c0_i32 = arith.constant 0 : i32
    %c15_i32 = arith.constant 15 : i32
    %11 = vector.broadcast %c0_i32 : i32 to vector<3x1024xi32>
    %12 = arith.maxsi %11, %10 : vector<3x1024xi32>
    %13 = vector.broadcast %c15_i32 : i32 to vector<3x1024xi32>
    %14 = arith.minsi %13, %12 : vector<3x1024xi32>
    %15 = vector.extract_strided_slice %14 {offsets = [0, 0], sizes = [1, 1024], strides = [1, 1]} : vector<3x1024xi32> to vector<1x1024xi32>
    %16 = vector.extract_strided_slice %14 {offsets = [1, 0], sizes = [1, 1024], strides = [1, 1]} : vector<3x1024xi32> to vector<1x1024xi32>
    %17 = vector.extract_strided_slice %14 {offsets = [2, 0], sizes = [1, 1024], strides = [1, 1]} : vector<3x1024xi32> to vector<1x1024xi32>
    %c16_i32 = arith.constant 16 : i32
    %18 = vector.broadcast %c16_i32 : i32 to vector<1x1024xi32>
    %19 = arith.muli %15, %18 : vector<1x1024xi32>
    %20 = arith.addi %19, %16 : vector<1x1024xi32>
    %21 = tpu.iota {dimensions = array<i32: 0>} : vector<256x1024xi32>
    %22 = vector.broadcast %20 : vector<1x1024xi32> to vector<256x1024xi32>
    %23 = arith.cmpi eq, %21, %22 : vector<256x1024xi32>
    %24 = arith.extui %23 : vector<256x1024xi1> to vector<256x1024xi32>
    %25 = arith.sitofp %24 : vector<256x1024xi32> to vector<256x1024xf32>
    %26 = arith.truncf %25 : vector<256x1024xf32> to vector<256x1024xbf16>
    %c0_4 = arith.constant 0 : index
    %c0_5 = arith.constant 0 : index
    %27 = vector.load %arg2[%c0_4, %c0_5] : memref<128x256xbf16, #tpu.memory_space<vmem>>, vector<128x256xbf16>
    %cst_6 = arith.constant dense<0.000000e+00> : vector<128x1024xf32>
    %28 = tpu.matmul %27, %26, %cst_6 {dimension_numbers = #tpu.dot_dimension_numbers<[1], [0], [0], [1], [0, 0, 1, 1], [], []>} : vector<128x256xbf16>, vector<256x1024xbf16>, vector<128x1024xf32> -> vector<128x1024xf32>
    %29 = vector.extract_strided_slice %28 {offsets = [0, 0], sizes = [64, 1024], strides = [1, 1]} : vector<128x1024xf32> to vector<64x1024xf32>
    %30 = vector.extract_strided_slice %28 {offsets = [64, 0], sizes = [64, 1024], strides = [1, 1]} : vector<128x1024xf32> to vector<64x1024xf32>
    %31 = arith.addf %29, %30 : vector<64x1024xf32>
    %32 = tpu.iota {dimensions = array<i32: 0>} : vector<16x1024xi32>
    %33 = vector.broadcast %17 : vector<1x1024xi32> to vector<16x1024xi32>
    %34 = arith.cmpi eq, %32, %33 : vector<16x1024xi32>
    %35 = vector.shape_cast %31 : vector<64x1024xf32> to vector<4x16x1024xf32>
    %36 = vector.shape_cast %34 : vector<16x1024xi1> to vector<1x16x1024xi1>
    %cst_7 = arith.constant 0.000000e+00 : f32
    %37 = vector.shape_cast %36 : vector<1x16x1024xi1> to vector<1x16x1024xi1>
    %38 = vector.broadcast %37 : vector<1x16x1024xi1> to vector<4x16x1024xi1>
    %39 = vector.broadcast %cst_7 : f32 to vector<4x16x1024xf32>
    %40 = arith.select %38, %35, %39 : vector<4x16x1024xi1>, vector<4x16x1024xf32>
    %cst_8 = arith.constant dense<0.000000e+00> : vector<4x1024xf32>
    %41 = vector.multi_reduction <add>, %40, %cst_8 [1] : vector<4x16x1024xf32> to vector<4x1024xf32>
    %cst_9 = arith.constant 0.000000e+00 : f32
    %42 = vector.shape_cast %5 : vector<1x1024xi1> to vector<1x1024xi1>
    %43 = vector.broadcast %42 : vector<1x1024xi1> to vector<4x1024xi1>
    %44 = vector.broadcast %cst_9 : f32 to vector<4x1024xf32>
    %45 = arith.select %43, %41, %44 : vector<4x1024xi1>, vector<4x1024xf32>
    %46 = tpu.iota {dimensions = array<i32: 0>} : vector<4x1024xi32>
    %c3_i32 = arith.constant 3 : i32
    %47 = vector.broadcast %c3_i32 : i32 to vector<4x1024xi32>
    %48 = arith.cmpi slt, %46, %47 : vector<4x1024xi32>
    %49 = arith.negf %45 : vector<4x1024xf32>
    %50 = math.exp %49 : vector<4x1024xf32>
    %cst_10 = arith.constant 1.000000e+00 : f32
    %51 = vector.broadcast %cst_10 : f32 to vector<4x1024xf32>
    %52 = arith.addf %51, %50 : vector<4x1024xf32>
    %53 = arith.divf %51, %52 : vector<4x1024xf32>
    %cst_11 = arith.constant 0.000000e+00 : f32
    %54 = vector.broadcast %cst_11 : f32 to vector<4x1024xf32>
    %55 = arith.maximumf %45, %54 : vector<4x1024xf32>
    %56 = arith.select %48, %53, %55 : vector<4x1024xi1>, vector<4x1024xf32>
    %c0_12 = arith.constant 0 : index
    %c0_13 = arith.constant 0 : index
    %57 = vector.load %arg3[%c0_12, %c0_13] : memref<4x1024xf32, #tpu.memory_space<vmem>>, vector<4x1024xf32>
    tpu.vector_store %arg3[%c0_12, %c0_13], %56 {strides = array<i32>} : memref<4x1024xf32, #tpu.memory_space<vmem>>, vector<4x1024xf32>,
    return
  }
  func.func @transform_0(%arg0: i32) -> (i32, i32) {
    %c0_i32 = arith.constant 0 : i32
    %c0_i32_0 = arith.constant 0 : i32
    return %c0_i32, %arg0 : i32, i32
  }
  func.func @transform_1(%arg0: i32) -> (i32, i32) {
    %c0_i32 = arith.constant 0 : i32
    %c0_i32_0 = arith.constant 0 : i32
    %c0_i32_1 = arith.constant 0 : i32
    return %c0_i32, %c0_i32_0 : i32, i32
  }
  func.func @transform_2(%arg0: i32) -> (i32, i32) {
    %c0_i32 = arith.constant 0 : i32
    %c0_i32_0 = arith.constant 0 : i32
    return %c0_i32, %arg0 : i32, i32
  }
}

</mosaic_0001>

<bundles_post_ra>
// kernel: tpu_custom_call.1
= control target key start
LH: loop header
LB: loop body
LE: loop exit
PB: predicated region body
PF: predicated region fallthrough
CT: control target
= control target key end

     0   :  { %7 = vsyncpa [#allocation3], 0  ;;  %s5826_s0 = inlined_call_operand.hbm [shape: f32[3,8192], index: 0, kind: input, shape index: {}]   ;;  %s5827_s1 = inlined_call_operand.hbm [shape: bf16[128,256], index: 1, kind: input, shape index: {}]   ;;  %s5828_s2 = inlined_call_operand.hbm [shape: f32[4,8192], index: 2, kind: output, shape index: {}]  }
   0x1   :  { %9 = vsyncpa [#allocation3 + $0x1], 0 }
   0x2   :  { %10 = vsyncpa [#allocation6], 0 }
   0x3   :  { %11 = vsyncpa [#allocation4], 0 }
   0x4   :  { %13 = vsyncpa [#allocation4 + $0x1], 0  ;;  %s3414_s9 = smov 0   ;;  %s3416_s10 = smov 0  }
   0x5   :  { %s3418_s11 = smov 0   ;;  %s3420_s12 = smov 0  }
   0x6 LB: > { %s3435_s13 = sadd.s32 4294967295, %s3391_s12   ;;  %s2582_s14 = sadd.s32 4294967294, %s3391_s12   ;;  %s3391_s12 = sphi %s3420_s12, %s6017_s12   ;;  %s3387_s11 = sphi %s3418_s11, %s6016_s11   ;;  %s3383_s10 = sphi %s3416_s10, %s6015_s10   ;;  %s3379_s9 = sphi %s3414_s9, %s6014_s9  }
   0x7   : > { %p39_p0 = scmp.ne.s32.totalorder %s3383_s10, %s3379_s9  ;;  %p5829_p1 = scmp.eq.s32.totalorder %s3435_s13, 0 }
   0x8   : > { %p90_p3 = scmp.eq.s32.totalorder %s2582_s14, 7  ;;  %p2583_p5 = scmp.ge.s32.totalorder %s3391_s12, 1 }
   0x9   : > { %p3444_p4 = por %p5829_p1, %p39_p0  ;;  %p97_p7 = scmp.lt.s32.totalorder %s3391_s12, 9 }
   0xa   : > { %p3449_p6 = por %p90_p3, %p39_p0  ;;  %s3393_s18 = smov [#allocation5]  }
   0xb   : > { %s5834_s15 = scalar_select %p3444_p4, 1, 0 }
   0xc   : > { %s5835_s16 = scalar_select %p3449_p6, 1, 0 }
   0xd   : > { %p3454_p8 = pnand %p2583_p5, %p97_p7  ;;  %s109_s19 = sshll.u32 %s3393_s18, 4  ;;  %s110_s19 = int_to_ptr.vmem [resolvable:$true] %s109_s19 }
   0xe   : > { %s3467_s21 = sadd.s32 1, %s3391_s12   ;;  %s26_s22 = sadd.s32 1, %s3387_s11 }
   0xf   : > { %s5836_s17 = scalar_select %p3454_p8, 1, 0 }
  0x10   : > { %p3156_p9 = pneg %p3454_p8  ;;  %s23_s23 = ssub.s32 %s3391_s12, %s3467_s21 }
  0x11   : > { %s3280_s24 = scalar_lea.vmem %s110_s19, 2048  ;;  %p3288_p3 = scmp.lt.s32.totalorder %s110_s19, %s110_s19 }
  0x12   : > { %p3462_p10 = pnand %p3156_p9, %p5829_p1  ;;  %p3281_p12 = scmp.ne.s32.totalorder %s110_s19, %s3280_s24 }
  0x13   : > { %p3289_p5 = scmp.lt.s32.totalorder %s3280_s24, %s3280_s24 }
  0x14   : > { %p3271_p11 = pneg %p3462_p10 }
  0x15   : > { %p3290_p7 = por %p3289_p5, %p3288_p3 }
  0x16   : > { %p3283_p13 = pnand %p3281_p12, %p3271_p11 }
  0x18   : > { %p3284_p0 = pneg %p3283_p13 }
  0x1a   : > { %p3291_p2 = pnand %p3290_p7, %p3284_p0 }
  0x1c   : > { %3294 = shalt.err (!%p3291_p2)
}
  0x1d   : > { %s3394_s25 = smov 128   ;;  %s3395_s26 = smov 8  }
  0x1e   : > { %3159 = dma.hbm_to_vmem [thread:$0]  (!%p3462_p10), %s5827_s1, 2048, %s110_s19, [#allocation6], %s3394_s25, %s3394_s25, %s3395_s26  }
  0x1f   : > { %p24_p9 = scmp.eq.s32.totalorder %s23_s23, 0  ;;  %p33_p11 = scmp.ne.s32.totalorder %s3387_s11, %s3383_s10 }
  0x20   : > { %p34_p12 = scmp.eq.s32.totalorder %s3391_s12, 0  ;;  %p3169_p2 = scmp.lt.s32.totalorder %s3391_s12, 8 }
  0x21   : > { %s3484_s29 = scalar_select %p24_p9, %s3387_s11, %s26_s22  }
  0x22   : > { %p35_p13 = por %p34_p12, %p33_p11  ;;  %p5838_p0 = scmp.eq.s32.totalorder %s3435_s13, 7 }
  0x23   : > { %s123_s3 = sand.u32 1, %s3387_s11   ;;  %s3138_s4 = sshll.u32 %s3391_s12, 9 }
  0x24   : > { %p3488_p3 = por %p5838_p0, %p33_p11  ;;  %s2586_s5 = sshll.u32 %s123_s3, 5 }
  0x25   : > { %s3497_s8 = scalar_lea.hbm %s5826_s0, %s3138_s4  ;;  %s127_s14 = scalar_lea.vmem [#allocation2], %s2586_s5 }
  0x26   : > { %s5839_s30 = scalar_select %p3488_p3, 1, 0 }
  0x27   : > { %s135_s18 = sshll.u32 %s127_s14, 4  ;;  %p3499_p10 = pnand %p3169_p2, %p35_p13  ;;  %s136_s18 = int_to_ptr.vmem [resolvable:$true] %s135_s18 }
  0x28   : > { %s124_s20 = scalar_lea.sflag [#allocation3], %s123_s3  ;;  %s3295_s22 = scalar_lea.hbm %s3497_s8, 512 }
  0x29   : > { %p3296_p5 = scmp.ne.s32.totalorder %s3497_s8, %s3295_s22  ;;  %p3297_p7 = pneg %p3499_p10 }
  0x2a   : > { %s3300_s25 = scalar_lea.hbm %s5826_s0, 4096  ;;  %p3301_p12 = scmp.lt.s32.totalorder %s3497_s8, %s5826_s0 }
  0x2b   : > { %p3298_p9 = pnand %p3297_p7, %p3296_p5  ;;  %p3302_p2 = scmp.lt.s32.totalorder %s3300_s25, %s3295_s22 }
  0x2d   : > { %p3299_p11 = pneg %p3298_p9  ;;  %p3303_p13 = por %p3302_p2, %p3301_p12 }
  0x2f   : > { %p3304_p0 = pnand %p3303_p13, %p3299_p11 }
  0x31   : > { %3307 = shalt.err (!%p3304_p0)
}
  0x32   : > { %s3308_s28 = scalar_lea.vmem %s136_s18, 512  ;;  %s3396_s3 = smov [#allocation2]  }
  0x33   : > { %p3309_p1 = scmp.ne.s32.totalorder %s136_s18, %s3308_s28  ;;  %s3313_s4 = sshll.u32 %s3396_s3, 4  ;;  %s3314_s4 = int_to_ptr.vmem [resolvable:$false] %s3313_s4 }
  0x34   : > { %s3315_s5 = scalar_lea.vmem %s3314_s4, 1024  ;;  %p3316_p5 = scmp.lt.s32.totalorder %s136_s18, %s3314_s4 }
  0x35   : > { %p3311_p6 = pnand %p3309_p1, %p3297_p7  ;;  %p3317_p9 = scmp.lt.s32.totalorder %s3315_s5, %s3308_s28 }
  0x37   : > { %p3312_p3 = pneg %p3311_p6  ;;  %p3318_p4 = por %p3317_p9, %p3316_p5 }
  0x39   : > { %p3319_p8 = pnand %p3318_p4, %p3312_p3 }
  0x3b   : > { %3322 = shalt.err (!%p3319_p8)
}
  0x3c   : > { %3163 = dma.hbm_to_vmem [thread:$0]  (!%p3499_p10), %s3497_s8, 512, %s136_s18, %s124_s20  }
  0x3d   : > { %p5841_p11 = scmp.ne.s32.totalorder %s5836_s17, 0 }
  0x3f   : > { %144 = sbr.rel (%p5841_p11) target bundleno = 563 (0x233), region = 28 }
  0x44   : > { %s3520_s6 = sand.u32 1, %s3383_s10   ;;  %p5842_p1 = scmp.ne.s32.totalorder %s5834_s15, 0 }
  0x45   : > { %s2590_s7 = sshll.u32 %s3520_s6, 5  ;;  %s147_s14 = scalar_lea.sflag [#allocation3], %s3520_s6 }
  0x46   : > { %s3526_s22 = scalar_lea.vmem [#allocation2], %s2590_s7 }
  0x47   : > { %3366 = dma.done.wait (%p5842_p1), %s147_s14, 512  }
  0x48   : > { %3368 = vsyncadd (%p5842_p1), %s147_s14, 4294966784  ;;  %p5843_p4 = scmp.eq.s32.totalorder %s3435_s13, 0 }
  0x4a   : > { %3370 = dma.done.wait (%p5843_p4), [#allocation6], 2048   ;;  %p5844_p6 = pmov %p5843_p4 }
  0x4b   : > { %v177_v0 = vld [vmem:[%s3526_s22] sm:$0x77]  ;;  %v178_v1 = vld [vmem:[%s3526_s22 + $0x8] sm:$0x77]  ;;  %v306_v7 = vlaneseq  ;;  %v179_v39 = vld [vmem:[%s3526_s22 + $0x10] sm:$0x77] }
  0x4c   : > { %3372 = vsyncadd (%p5844_p6), [#allocation6], 4294965248  ;;  %v262_v2 = vmul.f32 16.0, %v177_v0  ;;  %v263_v3 = vmul.f32 16.0, %v178_v1  ;;  %v3208_v4 = vld [vmem:[#allocation5 + $0x4] ss:$8 sps:$4 sm:$0xff]  }
  0x4d   : > { %1427 = vmatprep.mubr.bf16.mxu0 %v3208_v4  ;;  %1540 = vmatprep.mubr.bf16.mxu1 %v3208_v4  ;;  %v3538_v12 = vshrl.u32 %v306_v7, 7  ;;  %v180_v40 = vld [vmem:[%s3526_s22 + $0x18] sm:$0x77]  ;;  %v3397_v41 = vmov 1.0|1.0   ;;  %v264_v42 = vmul.f32 16.0, %v179_v39 }
  0x4e   : > { %v266_v5 = vadd.f32 8.0, %v262_v2  ;;  %v267_v6 = vadd.f32 8.0, %v263_v3  ;;  %v265_v43 = vmul.f32 16.0, %v180_v40  ;;  %s5741_s15 = scalar_lea.vmem [#allocation7], %s2590_s7  ;;  %s3139_s17 = sshll.u32 %s3435_s13, 9 }
  0x4f   : > { %v3543_v16 = vsub.s32 0, %v3538_v12  ;;  %v3546_v17 = vsub.s32 4, %v3538_v12  ;;  %v3555_v25 = vadd.s32 112, %v3538_v12  ;;  %v3558_v26 = vadd.s32 120, %v3538_v12  ;;  %s2502_s8 = sshll.u32 %s5741_s15, 4  ;;  %s5788_s13 = scalar_lea.hbm %s5828_s2, %s3139_s17  ;;  %s2503_s8 = int_to_ptr.vmem [resolvable:$true] %s2502_s8 }
  0x50   : > { %v3140_v8 = vtrunc.f32 %v266_v5  ;;  %v3142_v9 = vtrunc.f32 %v267_v6  ;;  %v3565_v31 = vadd.s32 96, %v3538_v12  ;;  %v3568_v32 = vadd.s32 104, %v3538_v12  ;;  %s2488_s20 = scalar_lea.sflag [#allocation4], %s3520_s6  ;;  %s3323_s23 = scalar_lea.vmem %s2503_s8, 512 }
  0x51   : > { %v3583_v37 = vadd.s32 80, %v3538_v12  ;;  %v3586_v38 = vadd.s32 88, %v3538_v12  ;;  %v3627_v44 = vadd.s32 64, %v3538_v12  ;;  %v3630_v45 = vadd.s32 72, %v3538_v12  ;;  %p3324_p8 = scmp.ne.s32.totalorder %s2503_s8, %s3323_s23  ;;  %p6012_p3 = scmp.ne.s32.totalorder %s5839_s30, 0 }
  0x52   : > { %v3141_v10 = vcvt.f32.s32 %v3140_v8  ;;  %v3143_v11 = vcvt.f32.s32 %v3142_v9  ;;  %v268_v46 = vadd.f32 8.0, %v264_v42  ;;  %v269_v47 = vadd.f32 8.0, %v265_v43  ;;  %s3398_s24 = smov [#allocation7]  }
  0x53   : > { %v3654_v48 = vadd.s32 48, %v3538_v12  ;;  %v3662_v49 = vadd.s32 56, %v3538_v12  ;;  %v3665_v50 = vadd.s32 32, %v3538_v12  ;;  %v3684_v53 = vadd.s32 40, %v3538_v12  ;;  %p3325_p10 = pnand %p3324_p8, %p6012_p3  ;;  %s3327_s25 = sshll.u32 %s3398_s24, 4  ;;  %s3328_s25 = int_to_ptr.vmem [resolvable:$false] %s3327_s25 }
  0x54   : > { %vm274_vm0 = vcmp.gt.s32.totalorder %v3141_v10, 0  ;;  %vm276_vm1 = vcmp.gt.s32.totalorder %v3143_v11, 0  ;;  %v3144_v51 = vtrunc.f32 %v268_v46  ;;  %v3146_v52 = vtrunc.f32 %v269_v47  ;;  %v4977_v46 = vld [vmem:[#allocation5 + $0x74] ss:$8 sps:$4 sm:$0xff]   ;;  %v3231_v47 = vld [vmem:[#allocation5 + $0x70] ss:$8 sps:$4 sm:$0xff]   ;;  %p3330_p12 = scmp.lt.s32.totalorder %s2503_s8, %s3328_s25 }
  0x55   : > { %v275_v13 = vsel %vm274_vm0, %v3141_v10, 0  ;;  %v277_v14 = vsel %vm276_vm1, %v3143_v11, 0  ;;  %v3687_v54 = vadd.s32 16, %v3538_v12  ;;  %v3701_v55 = vadd.s32 24, %v3538_v12  ;;  %p3326_p7 = pneg %p3325_p10  ;;  %s3329_s26 = scalar_lea.vmem %s3328_s25, 1024 }
  0x56   : > { %vm282_vm2 = vcmp.lt.s32.totalorder %v275_v13, 15  ;;  %vm284_vm3 = vcmp.lt.s32.totalorder %v277_v14, 15  ;;  %v3704_v56 = vadd.s32 8, %v3538_v12  ;;  %v3718_v57 = vadd.s32 240, %v3538_v12  ;;  %p3331_p2 = scmp.lt.s32.totalorder %s3329_s26, %s3323_s23 }
  0x57   : > { %v3540_v15 = vsel %vm282_vm2, %v275_v13, 15  ;;  %v3548_v18 = vsel %vm284_vm3, %v277_v14, 15  ;;  %v3721_v58 = vadd.s32 248, %v3538_v12  ;;  %v3145_v59 = vcvt.f32.s32 %v3144_v51 }
  0x58   : > { %v290_v19 = vmul.u32 16, %v3540_v15  ;;  %v2593_v20 = vrot.slane %v3540_v15, 9  ;;  %v291_v21 = vmul.u32 16, %v3548_v18  ;;  %v2594_v22 = vrot.slane %v3548_v18, 9  ;;  %p3332_p13 = por %p3331_p2, %p3330_p12 }
  0x59   : > { %v3147_v60 = vcvt.f32.s32 %v3146_v52  ;;  %v3746_v61 = vadd.s32 224, %v3538_v12  ;;  %v3749_v62 = vadd.s32 232, %v3538_v12  ;;  %v3763_v63 = vadd.s32 208, %v3538_v12 }
  0x5a   : > { %v302_v23 = vadd.s32 %v2593_v20, %v290_v19  ;;  %v303_v24 = vadd.s32 %v2594_v22, %v291_v21  ;;  %v3766_v0 = vadd.s32 216, %v3538_v12  ;;  %v3780_v1 = vadd.s32 192, %v3538_v12  ;;  %p3333_p0 = pnand %p3332_p13, %p3326_p7 }
  0x5b   : > { %v3783_v2 = vadd.s32 200, %v3538_v12  ;;  %v3808_v3 = vadd.s32 176, %v3538_v12  ;;  %v3811_v4 = vadd.s32 184, %v3538_v12  ;;  %v3825_v5 = vadd.s32 160, %v3538_v12 }
  0x5c   : > { %v346_v27 = vrot.slane %v302_v23, %v3546_v17  ;;  %v354_v28 = vrot.slane %v303_v24, %v3546_v17  ;;  %v342_v29 = vrot.slane %v302_v23, %v3543_v16  ;;  %v350_v30 = vrot.slane %v303_v24, %v3543_v16 }
  0x5d   : > { %v3828_v6 = vadd.s32 168, %v3538_v12  ;;  %v3859_v9 = vadd.s32 144, %v3538_v12  ;;  %v3862_v10 = vadd.s32 152, %v3538_v12  ;;  %v3876_v11 = vadd.s32 128, %v3538_v12 }
  0x5e   : > { %v3571_v33 = vrot.slane %v346_v27, %v3543_v16  ;;  %v3574_v34 = vrot.slane %v354_v28, %v3543_v16  ;;  %v3577_v35 = vrot.slane %v342_v29, %v3543_v16  ;;  %v3580_v36 = vrot.slane %v350_v30, %v3543_v16 }
  0x5f   : > { %v3879_v13 = vadd.s32 136, %v3538_v12 }
  0x60   : > { %vm516_vm4 = vcmp.eq.s32.totalorder %v3555_v25, %v3571_v33  ;;  %vm524_vm5 = vcmp.eq.s32.totalorder %v3558_v26, %v3571_v33  ;;  %vm518_vm6 = vcmp.eq.s32.totalorder %v3555_v25, %v3574_v34  ;;  %vm526_vm7 = vcmp.eq.s32.totalorder %v3558_v26, %v3574_v34 }
  0x61   : > { %vm2869_vm8 = vmpackc.low %vm524_vm5, %vm516_vm4  ;;  %vm515_vm9 = vcmp.eq.s32.totalorder %v3555_v25, %v3577_v35  ;;  %vm523_vm10 = vcmp.eq.s32.totalorder %v3558_v26, %v3577_v35  ;;  %vm517_vm11 = vcmp.eq.s32.totalorder %v3555_v25, %v3580_v36  ;;  %vm525_vm12 = vcmp.eq.s32.totalorder %v3558_v26, %v3580_v36 }
  0x62   : > { %2870 = vmatprep.subr.msk.bf16.mxu0 %vm2869_vm8, %v3397_v41  ;;  %vm2933_vm13 = vmpackc.low %vm526_vm7, %vm518_vm6  ;;  %vm500_vm14 = vcmp.eq.s32.totalorder %v3565_v31, %v3571_v33  ;;  %vm508_vm15 = vcmp.eq.s32.totalorder %v3568_v32, %v3571_v33  ;;  %vm502_vm1 = vcmp.eq.s32.totalorder %v3565_v31, %v3574_v34  ;;  %vm510_vm2 = vcmp.eq.s32.totalorder %v3568_v32, %v3574_v34 }
  0x63   : > { %2934 = vmatprep.subr.msk.bf16.mxu1 %vm2933_vm13, %v3397_v41  ;;  %vm2871_vm0 = vmpackc.low %vm523_vm10, %vm515_vm9  ;;  %vm499_vm4 = vcmp.eq.s32.totalorder %v3565_v31, %v3577_v35  ;;  %vm507_vm5 = vcmp.eq.s32.totalorder %v3568_v32, %v3577_v35  ;;  %vm501_vm7 = vcmp.eq.s32.totalorder %v3565_v31, %v3580_v36  ;;  %vm509_vm8 = vcmp.eq.s32.totalorder %v3568_v32, %v3580_v36 }
  0x64   : > { %2872 = vmatpush1.bf16.msk.msra.mxu0 %vm2871_vm0, %v3397_v41  ;;  %vm2935_vm3 = vmpackc.low %vm525_vm12, %vm517_vm11  ;;  %vm484_vm10 = vcmp.eq.s32.totalorder %v3583_v37, %v3571_v33  ;;  %vm492_vm11 = vcmp.eq.s32.totalorder %v3586_v38, %v3571_v33  ;;  %vm486_vm13 = vcmp.eq.s32.totalorder %v3583_v37, %v3574_v34  ;;  %vm483_vm0 = vcmp.eq.s32.totalorder %v3583_v37, %v3577_v35 }
  0x65   : > { %2936 = vmatpush1.bf16.msk.msra.mxu1 %vm2935_vm3, %v3397_v41  ;;  %vm2873_vm6 = vmpackc.low %vm508_vm15, %vm500_vm14  ;;  %vm494_vm14 = vcmp.eq.s32.totalorder %v3586_v38, %v3574_v34  ;;  %vm485_vm3 = vcmp.eq.s32.totalorder %v3583_v37, %v3580_v36 }
  0x66   : > { %2874 = vmatprep.subr.msk.bf16.mxu0 %vm2873_vm6, %v3397_v41  ;;  %vm2937_vm9 = vmpackc.low %vm510_vm2, %vm502_vm1  ;;  %vm491_vm1 = vcmp.eq.s32.totalorder %v3586_v38, %v3577_v35  ;;  %vm468_vm6 = vcmp.eq.s32.totalorder %v3627_v44, %v3571_v33 }
  0x67   : > { %2938 = vmatprep.subr.msk.bf16.mxu1 %vm2937_vm9, %v3397_v41  ;;  %vm2875_vm12 = vmpackc.low %vm507_vm5, %vm499_vm4  ;;  %vm493_vm4 = vcmp.eq.s32.totalorder %v3586_v38, %v3580_v36  ;;  %vm470_vm9 = vcmp.eq.s32.totalorder %v3627_v44, %v3574_v34 }
  0x68   : > { %2876 = vmatpush1.bf16.msk.msra.mxu0 %vm2875_vm12, %v3397_v41  ;;  %vm2939_vm15 = vmpackc.low %vm509_vm8, %vm501_vm7  ;;  %vm476_vm7 = vcmp.eq.s32.totalorder %v3630_v45, %v3571_v33  ;;  %vm467_vm12 = vcmp.eq.s32.totalorder %v3627_v44, %v3577_v35 }
  0x69   : > { %2940 = vmatpush1.bf16.msk.msra.mxu1 %vm2939_vm15, %v3397_v41  ;;  %vm2877_vm2 = vmpackc.low %vm492_vm11, %vm484_vm10  ;;  %vm478_vm10 = vcmp.eq.s32.totalorder %v3630_v45, %v3574_v34  ;;  %vm469_vm15 = vcmp.eq.s32.totalorder %v3627_v44, %v3580_v36 }
  0x6a   : > { %2878 = vmatprep.subr.msk.bf16.mxu0 %vm2877_vm2, %v3397_v41  ;;  %vm2941_vm5 = vmpackc.low %vm494_vm14, %vm486_vm13  ;;  %vm475_vm13 = vcmp.eq.s32.totalorder %v3630_v45, %v3577_v35  ;;  %vm452_vm2 = vcmp.eq.s32.totalorder %v3654_v48, %v3571_v33 }
  0x6b   : > { %2942 = vmatprep.subr.msk.bf16.mxu1 %vm2941_vm5, %v3397_v41  ;;  %vm2879_vm8 = vmpackc.low %vm491_vm1, %vm483_vm0  ;;  %vm477_vm0 = vcmp.eq.s32.totalorder %v3630_v45, %v3580_v36  ;;  %vm454_vm5 = vcmp.eq.s32.totalorder %v3654_v48, %v3574_v34 }
  0x6c   : > { %2880 = vmatpush1.bf16.msk.msra.mxu0 %vm2879_vm8, %v3397_v41  ;;  %vm2943_vm11 = vmpackc.low %vm493_vm4, %vm485_vm3  ;;  %vm460_vm3 = vcmp.eq.s32.totalorder %v3662_v49, %v3571_v33  ;;  %vm451_vm8 = vcmp.eq.s32.totalorder %v3654_v48, %v3577_v35 }
  0x6d   : > { %2944 = vmatpush1.bf16.msk.msra.mxu1 %vm2943_vm11, %v3397_v41  ;;  %vm2881_vm14 = vmpackc.low %vm476_vm7, %vm468_vm6  ;;  %vm462_vm6 = vcmp.eq.s32.totalorder %v3662_v49, %v3574_v34  ;;  %vm453_vm11 = vcmp.eq.s32.totalorder %v3654_v48, %v3580_v36 }
  0x6e   : > { %2882 = vmatprep.subr.msk.bf16.mxu0 %vm2881_vm14, %v3397_v41  ;;  %vm2945_vm1 = vmpackc.low %vm478_vm10, %vm470_vm9  ;;  %vm459_vm9 = vcmp.eq.s32.totalorder %v3662_v49, %v3577_v35  ;;  %vm436_vm14 = vcmp.eq.s32.totalorder %v3665_v50, %v3571_v33 }
  0x6f   : > { %2946 = vmatprep.subr.msk.bf16.mxu1 %vm2945_vm1, %v3397_v41  ;;  %vm2883_vm4 = vmpackc.low %vm475_vm13, %vm467_vm12  ;;  %vm461_vm12 = vcmp.eq.s32.totalorder %v3662_v49, %v3580_v36  ;;  %vm280_vm1 = vcmp.gt.s32.totalorder %v3147_v60, 0 }
  0x70   : > { %2884 = vmatpush1.bf16.msk.msra.mxu0 %vm2883_vm4, %v3397_v41  ;;  %vm2947_vm7 = vmpackc.low %vm477_vm0, %vm469_vm15  ;;  %vm444_vm15 = vcmp.eq.s32.totalorder %v3684_v53, %v3571_v33  ;;  %vm278_vm0 = vcmp.gt.s32.totalorder %v3145_v59, 0  ;;  %vm446_vm4 = vcmp.eq.s32.totalorder %v3684_v53, %v3574_v34  ;;  %v3845_v8 = vsel %vm280_vm1, %v3147_v60, 0 }
  0x71   : > { %2948 = vmatpush1.bf16.msk.msra.mxu1 %vm2947_vm7, %v3397_v41  ;;  %vm2885_vm10 = vmpackc.low %vm460_vm3, %vm452_vm2  ;;  %vm438_vm3 = vcmp.eq.s32.totalorder %v3665_v50, %v3574_v34  ;;  %vm443_vm7 = vcmp.eq.s32.totalorder %v3684_v53, %v3577_v35  ;;  %v3842_v7 = vsel %vm278_vm0, %v3145_v59, 0  ;;  %vm430_vm0 = vcmp.eq.s32.totalorder %v3701_v55, %v3574_v34 }
  0x72   : > { %2886 = vmatprep.subr.msk.bf16.mxu0 %vm2885_vm10, %v3397_v41  ;;  %vm2949_vm13 = vmpackc.low %vm462_vm6, %vm454_vm5  ;;  %vm435_vm6 = vcmp.eq.s32.totalorder %v3665_v50, %v3577_v35  ;;  %vm445_vm10 = vcmp.eq.s32.totalorder %v3684_v53, %v3580_v36 }
  0x73   : > { %2950 = vmatprep.subr.msk.bf16.mxu1 %vm2949_vm13, %v3397_v41  ;;  %vm2887_vm2 = vmpackc.low %vm459_vm9, %vm451_vm8  ;;  %vm437_vm9 = vcmp.eq.s32.totalorder %v3665_v50, %v3580_v36  ;;  %vm428_vm13 = vcmp.eq.s32.totalorder %v3701_v55, %v3571_v33 }
  0x74   : > { %2888 = vmatpush1.bf16.msk.msra.mxu0 %vm2887_vm2, %v3397_v41  ;;  %vm2951_vm5 = vmpackc.low %vm461_vm12, %vm453_vm11  ;;  %vm420_vm12 = vcmp.eq.s32.totalorder %v3687_v54, %v3571_v33  ;;  %vm419_vm2 = vcmp.eq.s32.totalorder %v3687_v54, %v3577_v35 }
  0x75   : > { %2952 = vmatpush1.bf16.msk.msra.mxu1 %vm2951_vm5, %v3397_v41  ;;  %vm2889_vm8 = vmpackc.low %vm444_vm15, %vm436_vm14  ;;  %vm422_vm15 = vcmp.eq.s32.totalorder %v3687_v54, %v3574_v34  ;;  %vm5845_vm5 = vcmp.lt.s32.totalorder %v3842_v7, 15 }
  0x76   : > { %2890 = vmatprep.subr.msk.bf16.mxu0 %vm2889_vm8, %v3397_v41  ;;  %vm2953_vm11 = vmpackc.low %vm446_vm4, %vm438_vm3  ;;  %vm427_vm3 = vcmp.eq.s32.totalorder %v3701_v55, %v3577_v35  ;;  %vm429_vm8 = vcmp.eq.s32.totalorder %v3701_v55, %v3580_v36  ;;  %vm620_vm4 = vcmp.eq.s32.totalorder %v3766_v0, %v3571_v33  ;;  %v4013_v14 = vsel %vm5845_vm5, %v3842_v7, 15 }
  0x77   : > { %2954 = vmatprep.subr.msk.bf16.mxu1 %vm2953_vm11, %v3397_v41  ;;  %vm2891_vm14 = vmpackc.low %vm443_vm7, %vm435_vm6  ;;  %vm421_vm7 = vcmp.eq.s32.totalorder %v3687_v54, %v3580_v36  ;;  %v292_v20 = vmul.u32 16, %v4013_v14  ;;  %v2595_v21 = vrot.slane %v4013_v14, 9 }
  0x78   : > { %2892 = vmatpush1.bf16.msk.msra.mxu0 %vm2891_vm14, %v3397_v41  ;;  %vm2955_vm1 = vmpackc.low %vm445_vm10, %vm437_vm9  ;;  %vm404_vm9 = vcmp.eq.s32.totalorder %v3538_v12, %v3571_v33  ;;  %vm412_vm10 = vcmp.eq.s32.totalorder %v3704_v56, %v3571_v33  ;;  %vm403_vm14 = vcmp.eq.s32.totalorder %v3538_v12, %v3577_v35 }
  0x79   : > { %2956 = vmatpush1.bf16.msk.msra.mxu1 %vm2955_vm1, %v3397_v41  ;;  %vm2893_vm6 = vmpackc.low %vm428_vm13, %vm420_vm12  ;;  %vm406_vm12 = vcmp.eq.s32.totalorder %v3538_v12, %v3574_v34  ;;  %vm414_vm13 = vcmp.eq.s32.totalorder %v3704_v56, %v3574_v34  ;;  %vm411_vm1 = vcmp.eq.s32.totalorder %v3704_v56, %v3577_v35  ;;  %v304_v24 = vadd.s32 %v2595_v21, %v292_v20 }
  0x7a   : > { %2894 = vmatprep.subr.msk.bf16.mxu0 %vm2893_vm6, %v3397_v41  ;;  %vm2957_vm11 = vmpackc.low %vm430_vm0, %vm422_vm15  ;;  %vm405_vm0 = vcmp.eq.s32.totalorder %v3538_v12, %v3580_v36  ;;  %vm413_vm6 = vcmp.eq.s32.totalorder %v3704_v56, %v3580_v36 }
  0x7b   : > { %2958 = vmatprep.subr.msk.bf16.mxu1 %vm2957_vm11, %v3397_v41  ;;  %vm2895_vm15 = vmpackc.low %vm427_vm3, %vm419_vm2  ;;  %vm646_vm3 = vcmp.eq.s32.totalorder %v3718_v57, %v3574_v34  ;;  %vm654_vm11 = vcmp.eq.s32.totalorder %v3721_v58, %v3574_v34  ;;  %v362_v28 = vrot.slane %v304_v24, %v3546_v17  ;;  %v358_v30 = vrot.slane %v304_v24, %v3543_v16 }
  0x7c   : > { %2896 = vmatpush1.bf16.msk.msra.mxu0 %vm2895_vm15, %v3397_v41  ;;  %vm2959_vm2 = vmpackc.low %vm429_vm8, %vm421_vm7  ;;  %vm645_vm8 = vcmp.eq.s32.totalorder %v3718_v57, %v3580_v36  ;;  %vm653_vm15 = vcmp.eq.s32.totalorder %v3721_v58, %v3580_v36  ;;  %v5173_v24 = vsub.s32 6, %v3538_v12 }
  0x7d   : > { %2960 = vmatpush1.bf16.msk.msra.mxu1 %vm2959_vm2, %v3397_v41  ;;  %vm2897_vm7 = vmpackc.low %vm412_vm10, %vm404_vm9  ;;  %vm630_vm10 = vcmp.eq.s32.totalorder %v3746_v61, %v3574_v34  ;;  %vm638_vm2 = vcmp.eq.s32.totalorder %v3749_v62, %v3574_v34  ;;  %v4112_v42 = vrot.slane %v358_v30, %v3543_v16 }
  0x7e   : > { %2898 = vmatprep.subr.msk.bf16.mxu0 %vm2897_vm7, %v3397_v41  ;;  %vm2961_vm9 = vmpackc.low %vm414_vm13, %vm406_vm12  ;;  %vm629_vm13 = vcmp.eq.s32.totalorder %v3746_v61, %v3580_v36  ;;  %vm637_vm7 = vcmp.eq.s32.totalorder %v3749_v62, %v3580_v36 }
  0x7f   : > { %2962 = vmatprep.subr.msk.bf16.mxu1 %vm2961_vm9, %v3397_v41  ;;  %vm2899_vm12 = vmpackc.low %vm411_vm1, %vm403_vm14  ;;  %vm622_vm9 = vcmp.eq.s32.totalorder %v3766_v0, %v3574_v34 }
  0x80   : > { %2900 = vmatpush1.bf16.msk.msra.mxu0 %vm2899_vm12, %v3397_v41  ;;  %vm2963_vm14 = vmpackc.low %vm413_vm6, %vm405_vm0  ;;  %vm5846_vm12 = vcmp.lt.s32.totalorder %v3845_v8, 15  ;;  %vm5847_vm0 = vcmp.eq.s32.totalorder %v3718_v57, %v3571_v33  ;;  %vm5848_vm6 = vcmp.eq.s32.totalorder %v3721_v58, %v3571_v33 }
  0x81   : > { %v4018_v19 = vsel %vm5846_vm12, %v3845_v8, 15  ;;  %2964 = vmatpush1.bf16.msk.msra.mxu1 %vm2963_vm14, %v3397_v41  ;;  %vm2901_vm1 = vmpackc.low %vm5848_vm6, %vm5847_vm0  ;;  %vm613_vm0 = vcmp.eq.s32.totalorder %v3763_v63, %v3580_v36  ;;  %vm621_vm6 = vcmp.eq.s32.totalorder %v3766_v0, %v3580_v36  ;;  %vm573_vm12 = vcmp.eq.s32.totalorder %v3828_v6, %v3580_v36 }
  0x82   : > { %v293_v22 = vmul.u32 16, %v4018_v19  ;;  %v2596_v23 = vrot.slane %v4018_v19, 9  ;;  %2902 = vmatprep.subr.msk.bf16.mxu0 %vm2901_vm1, %v3397_v41  ;;  %vm2965_vm5 = vmpackc.low %vm654_vm11, %vm646_vm3  ;;  %vm5849_vm1 = vcmp.eq.s32.totalorder %v3718_v57, %v3577_v35  ;;  %vm5850_vm3 = vcmp.eq.s32.totalorder %v3721_v58, %v3577_v35 }
  0x83   : > { %2966 = vmatprep.subr.msk.bf16.mxu1 %vm2965_vm5, %v3397_v41  ;;  %vm2903_vm11 = vmpackc.low %vm5850_vm3, %vm5849_vm1  ;;  %vm598_vm1 = vcmp.eq.s32.totalorder %v3780_v1, %v3574_v34  ;;  %vm606_vm3 = vcmp.eq.s32.totalorder %v3783_v2, %v3574_v34 }
  0x84   : > { %v305_v27 = vadd.s32 %v2596_v23, %v293_v22  ;;  %2904 = vmatpush2.bf16.msk.msra.mxu0 %vm2903_vm11, %v3397_v41  ;;  %vm2967_vm5 = vmpackc.low %vm653_vm15, %vm645_vm8  ;;  %vm5851_vm11 = vcmp.eq.s32.totalorder %v3746_v61, %v3571_v33  ;;  %vm5852_vm8 = vcmp.eq.s32.totalorder %v3749_v62, %v3571_v33 }
  0x85   : > { %2968 = vmatpush2.bf16.msk.msra.mxu1 %vm2967_vm5, %v3397_v41  ;;  %vm2905_vm15 = vmpackc.low %vm5852_vm8, %vm5851_vm11  ;;  %vm597_vm11 = vcmp.eq.s32.totalorder %v3780_v1, %v3580_v36  ;;  %vm605_vm8 = vcmp.eq.s32.totalorder %v3783_v2, %v3580_v36 }
  0x86   : > { %v370_v29 = vrot.slane %v305_v27, %v3546_v17  ;;  %v366_v39 = vrot.slane %v305_v27, %v3543_v16  ;;  %2906 = vmatprep.subr.msk.bf16.mxu0 %vm2905_vm15, %v3397_v41  ;;  %vm2969_vm5 = vmpackc.low %vm638_vm2, %vm630_vm10  ;;  %vm5853_vm15 = vcmp.eq.s32.totalorder %v3746_v61, %v3577_v35  ;;  %vm5854_vm10 = vcmp.eq.s32.totalorder %v3749_v62, %v3577_v35 }
  0x87   : > { %2970 = vmatprep.subr.msk.bf16.mxu1 %vm2969_vm5, %v3397_v41  ;;  %vm2907_vm2 = vmpackc.low %vm5854_vm10, %vm5853_vm15  ;;  %v4106_v17 = vrot.slane %v362_v28, %v3543_v16  ;;  %vm574_vm15 = vcmp.eq.s32.totalorder %v3828_v6, %v3574_v34 }
  0x88   : > { %v4109_v40 = vrot.slane %v370_v29, %v3543_v16  ;;  %v4115_v43 = vrot.slane %v366_v39, %v3543_v16  ;;  %2908 = vmatpush2.bf16.msk.msra.mxu0 %vm2907_vm2, %v3397_v41  ;;  %vm2971_vm5 = vmpackc.low %vm637_vm7, %vm629_vm13  ;;  %vm5855_vm2 = vcmp.eq.s32.totalorder %v3763_v63, %v3571_v33  ;;  %vm581_vm7 = vcmp.eq.s32.totalorder %v3808_v3, %v3580_v36  ;;  %v4505_v16 = vld [vmem:[#allocation5] ss:$8 sps:$4 sm:$0xff]  }
  0x89   : > { %2972 = vmatpush2.bf16.msk.msra.mxu1 %vm2971_vm5, %v3397_v41  ;;  %vm2909_vm13 = vmpackc.low %vm620_vm4, %vm5855_vm2  ;;  %vm5856_vm4 = vcmp.eq.s32.totalorder %v3763_v63, %v3574_v34  ;;  %vm566_vm5 = vcmp.eq.s32.totalorder %v3825_v5, %v3574_v34 }
  0x8a   : > { %2910 = vmatprep.subr.msk.bf16.mxu0 %vm2909_vm13, %v3397_v41  ;;  %vm2973_vm2 = vmpackc.low %vm622_vm9, %vm5856_vm4  ;;  %vm5857_vm9 = vcmp.eq.s32.totalorder %v3763_v63, %v3577_v35  ;;  %vm5858_vm4 = vcmp.eq.s32.totalorder %v3766_v0, %v3577_v35 }
  0x8b   : > { %2974 = vmatprep.subr.msk.bf16.mxu1 %vm2973_vm2, %v3397_v41  ;;  %vm2911_vm14 = vmpackc.low %vm5858_vm4, %vm5857_vm9  ;;  %vm565_vm2 = vcmp.eq.s32.totalorder %v3825_v5, %v3580_v36  ;;  %vm558_vm4 = vcmp.eq.s32.totalorder %v3862_v10, %v3574_v34 }
  0x8c   : > { %2912 = vmatpush2.bf16.msk.msra.mxu0 %vm2911_vm14, %v3397_v41  ;;  %vm2975_vm9 = vmpackc.low %vm621_vm6, %vm613_vm0  ;;  %vm5859_vm0 = vcmp.eq.s32.totalorder %v3780_v1, %v3571_v33  ;;  %vm5860_vm6 = vcmp.eq.s32.totalorder %v3783_v2, %v3571_v33 }
  0x8d   : > { %2976 = vmatpush2.bf16.msk.msra.mxu1 %vm2975_vm9, %v3397_v41  ;;  %vm2913_vm10 = vmpackc.low %vm5860_vm6, %vm5859_vm0  ;;  %vm550_vm9 = vcmp.eq.s32.totalorder %v3859_v9, %v3574_v34 }
  0x8e   : > { %2914 = vmatprep.subr.msk.bf16.mxu0 %vm2913_vm10, %v3397_v41  ;;  %vm2977_vm0 = vmpackc.low %vm606_vm3, %vm598_vm1  ;;  %vm5861_vm1 = vcmp.eq.s32.totalorder %v3780_v1, %v3577_v35  ;;  %vm5862_vm3 = vcmp.eq.s32.totalorder %v3783_v2, %v3577_v35  ;;  %vm5889_vm10 = vcmp.eq.s32.totalorder %v3558_v26, %v4115_v43 }
  0x8f   : > { %2978 = vmatprep.subr.msk.bf16.mxu1 %vm2977_vm0, %v3397_v41  ;;  %vm2915_vm13 = vmpackc.low %vm5862_vm3, %vm5861_vm1  ;;  %vm549_vm0 = vcmp.eq.s32.totalorder %v3859_v9, %v3580_v36  ;;  %vm542_vm3 = vcmp.eq.s32.totalorder %v3879_v13, %v3574_v34 }
  0x90   : > { %2916 = vmatpush2.bf16.msk.msra.mxu0 %vm2915_vm13, %v3397_v41  ;;  %vm2979_vm1 = vmpackc.low %vm605_vm8, %vm597_vm11  ;;  %vm5863_vm11 = vcmp.eq.s32.totalorder %v3808_v3, %v3571_v33  ;;  %vm5864_vm8 = vcmp.eq.s32.totalorder %v3811_v4, %v3571_v33  ;;  %vm648_vm13 = vcmp.eq.s32.totalorder %v3718_v57, %v4106_v17 }
  0x91   : > { %2980 = vmatpush2.bf16.msk.msra.mxu1 %vm2979_vm1, %v3397_v41  ;;  %vm2917_vm14 = vmpackc.low %vm5864_vm8, %vm5863_vm11  ;;  %vm5865_vm11 = vcmp.eq.s32.totalorder %v3808_v3, %v3574_v34  ;;  %vm5866_vm8 = vcmp.eq.s32.totalorder %v3811_v4, %v3574_v34  ;;  %vm534_vm1 = vcmp.eq.s32.totalorder %v3876_v11, %v3574_v34  ;;  %v4777_v34 = vld [vmem:[#allocation5 + $0x30] ss:$8 sps:$4 sm:$0xff]  }
  0x92   : > { %2918 = vmatprep.subr.msk.bf16.mxu0 %vm2917_vm14, %v3397_v41  ;;  %vm2981_vm6 = vmpackc.low %vm5866_vm8, %vm5865_vm11  ;;  %vm5867_vm14 = vcmp.eq.s32.totalorder %v3808_v3, %v3577_v35  ;;  %vm5868_vm11 = vcmp.eq.s32.totalorder %v3811_v4, %v3577_v35 }
  0x93   : > { %2982 = vmatprep.subr.msk.bf16.mxu1 %vm2981_vm6, %v3397_v41  ;;  %vm2919_vm8 = vmpackc.low %vm5868_vm11, %vm5867_vm14  ;;  %vm5869_vm6 = vcmp.eq.s32.totalorder %v3811_v4, %v3580_v36  ;;  %vm5891_vm11 = vcmp.eq.s32.totalorder %v3568_v32, %v4106_v17 }
  0x94   : > { %2920 = vmatpush2.bf16.msk.msra.mxu0 %vm2919_vm8, %v3397_v41  ;;  %vm2983_vm14 = vmpackc.low %vm5869_vm6, %vm581_vm7  ;;  %vm5870_vm8 = vcmp.eq.s32.totalorder %v3825_v5, %v3571_v33  ;;  %vm5871_vm7 = vcmp.eq.s32.totalorder %v3828_v6, %v3571_v33 }
  0x95   : > { %2984 = vmatpush2.bf16.msk.msra.mxu1 %vm2983_vm14, %v3397_v41  ;;  %vm2921_vm6 = vmpackc.low %vm5871_vm7, %vm5870_vm8  ;;  %vm532_vm8 = vcmp.eq.s32.totalorder %v3876_v11, %v3571_v33  ;;  %vm540_vm7 = vcmp.eq.s32.totalorder %v3879_v13, %v3571_v33 }
  0x96   : > { %2922 = vmatprep.subr.msk.bf16.mxu0 %vm2921_vm6, %v3397_v41  ;;  %vm2985_vm14 = vmpackc.low %vm574_vm15, %vm566_vm5  ;;  %vm5872_vm6 = vcmp.eq.s32.totalorder %v3825_v5, %v3577_v35  ;;  %vm5873_vm15 = vcmp.eq.s32.totalorder %v3828_v6, %v3577_v35 }
  0x97   : > { %2986 = vmatprep.subr.msk.bf16.mxu1 %vm2985_vm14, %v3397_v41  ;;  %vm2923_vm5 = vmpackc.low %vm5873_vm15, %vm5872_vm6  ;;  %vm531_vm6 = vcmp.eq.s32.totalorder %v3876_v11, %v3577_v35  ;;  %vm656_vm15 = vcmp.eq.s32.totalorder %v3721_v58, %v4106_v17 }
  0x98   : > { %2924 = vmatpush2.bf16.msk.msra.mxu0 %vm2923_vm5, %v3397_v41  ;;  %vm2987_vm14 = vmpackc.low %vm573_vm12, %vm565_vm2  ;;  %vm5874_vm5 = vcmp.eq.s32.totalorder %v3859_v9, %v3571_v33  ;;  %vm5875_vm12 = vcmp.eq.s32.totalorder %v3862_v10, %v3571_v33  ;;  %v4537_v33 = vld [vmem:[#allocation5 + $0x14] ss:$8 sps:$4 sm:$0xff]  }
  0x99   : > { %2988 = vmatpush2.bf16.msk.msra.mxu1 %vm2987_vm14, %v3397_v41  ;;  %vm2925_vm2 = vmpackc.low %vm5875_vm12, %vm5874_vm5  ;;  %vm632_vm5 = vcmp.eq.s32.totalorder %v3746_v61, %v4106_v17  ;;  %vm409_vm12 = vcmp.eq.s32.totalorder %v3538_v12, %v4115_v43 }
  0x9a   : > { %2926 = vmatprep.subr.msk.bf16.mxu0 %vm2925_vm2, %v3397_v41  ;;  %vm2989_vm14 = vmpackc.low %vm558_vm4, %vm550_vm9  ;;  %vm5876_vm2 = vcmp.eq.s32.totalorder %v3859_v9, %v3577_v35  ;;  %vm5877_vm4 = vcmp.eq.s32.totalorder %v3862_v10, %v3577_v35 }
  0x9b   : > { %2990 = vmatprep.subr.msk.bf16.mxu1 %vm2989_vm14, %v3397_v41  ;;  %vm2927_vm9 = vmpackc.low %vm5877_vm4, %vm5876_vm2  ;;  %vm5878_vm14 = vcmp.eq.s32.totalorder %v3862_v10, %v3580_v36  ;;  %vm631_vm4 = vcmp.eq.s32.totalorder %v3746_v61, %v4112_v42 }
  0x9c   : > { %2928 = vmatpush2.bf16.msk.msra.mxu0 %vm2927_vm9, %v3397_v41  ;;  %vm2991_vm2 = vmpackc.low %vm5878_vm14, %vm549_vm0 }
  0x9d   : > { %2992 = vmatpush2.bf16.msk.msra.mxu1 %vm2991_vm2, %v3397_v41  ;;  %vm2929_vm0 = vmpackc.low %vm540_vm7, %vm532_vm8  ;;  %vm5880_vm2 = vcmp.eq.s32.totalorder %v3876_v11, %v3580_v36 }
  0x9e   : > { %2930 = vmatprep.subr.msk.bf16.mxu0 %vm2929_vm0, %v3397_v41  ;;  %vm2993_vm8 = vmpackc.low %vm542_vm3, %vm534_vm1  ;;  %vm5879_vm3 = vcmp.eq.s32.totalorder %v3879_v13, %v3577_v35  ;;  %vm5884_vm0 = vcmp.eq.s32.totalorder %v3555_v25, %v4109_v40  ;;  %v4793_v35 = vld [vmem:[#allocation5 + $0x44] ss:$8 sps:$4 sm:$0xff]  }
  0x9f   : > { %2994 = vmatprep.subr.msk.bf16.mxu1 %vm2993_vm8, %v3397_v41  ;;  %vm2931_vm1 = vmpackc.low %vm5879_vm3, %vm531_vm6  ;;  %vm5881_vm6 = vcmp.eq.s32.totalorder %v3879_v13, %v3580_v36  ;;  %vm5893_vm8 = vcmp.eq.s32.totalorder %v3568_v32, %v4109_v40  ;;  %v4839_v36 = vld [vmem:[#allocation5 + $0x40] ss:$8 sps:$4 sm:$0xff]  }
  0xa0   : > { %2932 = vmatpush2.bf16.msk.msra.mxu0 %vm2931_vm1, %v3397_v41  ;;  %vm2995_vm3 = vmpackc.low %vm5881_vm6, %vm5880_vm2  ;;  %vm5882_vm1 = vcmp.eq.s32.totalorder %v3555_v25, %v4106_v17  ;;  %vm5883_vm2 = vcmp.eq.s32.totalorder %v3558_v26, %v4106_v17 }
  0xa1   : > { %2996 = vmatpush2.bf16.msk.msra.mxu1 %vm2995_vm3, %v3397_v41  ;;  %vm2997_vm6 = vmpackc.low %vm5883_vm2, %vm5882_vm1  ;;  %vm5885_vm1 = vcmp.eq.s32.totalorder %v3558_v26, %v4109_v40  ;;  %vm5902_vm3 = vcmp.eq.s32.totalorder %v3583_v37, %v4112_v42 }
  0xa2   : > { %2998 = vmatprep.subr.msk.bf16.mxu0 %vm2997_vm6, %v3397_v41  ;;  %vm3061_vm2 = vmpackc.low %vm5885_vm1, %vm5884_vm0  ;;  %vm5886_vm6 = vcmp.eq.s32.totalorder %v3555_v25, %v4112_v42  ;;  %vm5887_vm0 = vcmp.eq.s32.totalorder %v3558_v26, %v4112_v42  ;;  %v4657_v26 = vld [vmem:[#allocation5 + $0x24] ss:$8 sps:$4 sm:$0xff]  }
  0xa3   : > { %1428 = vmatmul.mubr.bf16.vlgmr.msra.gmra.mxu0 %v4505_v16  ;;  %3062 = vmatprep.subr.msk.bf16.mxu1 %vm3061_vm2, %v3397_v41  ;;  %vm2999_vm1 = vmpackc.low %vm5887_vm0, %vm5886_vm6  ;;  %vm5888_vm2 = vcmp.eq.s32.totalorder %v3555_v25, %v4115_v43  ;;  %v4625_v25 = vld [vmem:[#allocation5 + $0x10] ss:$8 sps:$4 sm:$0xff]   ;;  %vm5937_vm0 = vcmp.eq.s32.totalorder %v3701_v55, %v4115_v43 }
  0xa4   : > { %1541 = vmatmul.mubr.bf16.vlgmr.msra.gmra.mxu1 %v4505_v16  ;;  %3000 = vmatpush1.bf16.msk.msra.mxu0 %vm2999_vm1, %v3397_v41  ;;  %vm3063_vm6 = vmpackc.low %vm5889_vm10, %vm5888_vm2  ;;  %vm5890_vm1 = vcmp.eq.s32.totalorder %v3565_v31, %v4106_v17  ;;  %vm5895_vm10 = vcmp.eq.s32.totalorder %v3568_v32, %v4112_v42  ;;  %vm5907_vm2 = vcmp.eq.s32.totalorder %v3630_v45, %v4106_v17 }
  0xa5   : > { %3064 = vmatpush1.bf16.msk.msra.mxu1 %vm3063_vm6, %v3397_v41  ;;  %vm3001_vm7 = vmpackc.low %vm5891_vm11, %vm5890_vm1  ;;  %1437 = vmatprep.mubr.bf16.mxu0 %v4537_v33  ;;  %vm5892_vm6 = vcmp.eq.s32.totalorder %v3565_v31, %v4109_v40  ;;  %vm5896_vm1 = vcmp.eq.s32.totalorder %v3565_v31, %v4115_v43 }
  0xa6   : > { %3002 = vmatprep.subr.msk.bf16.mxu0 %vm3001_vm7, %v3397_v41  ;;  %vm3065_vm11 = vmpackc.low %vm5893_vm8, %vm5892_vm6  ;;  %1550 = vmatprep.mubr.bf16.mxu1 %v4537_v33  ;;  %vm5894_vm7 = vcmp.eq.s32.totalorder %v3565_v31, %v4112_v42  ;;  %vm5900_vm6 = vcmp.eq.s32.totalorder %v3583_v37, %v4109_v40  ;;  %v4713_v31 = vld [vmem:[#allocation5 + $0x20] ss:$8 sps:$4 sm:$0xff]  }
  0xa7   : > { %3066 = vmatprep.subr.msk.bf16.mxu1 %vm3065_vm11, %v3397_v41  ;;  %vm3003_vm8 = vmpackc.low %vm5895_vm10, %vm5894_vm7  ;;  %vm5897_vm10 = vcmp.eq.s32.totalorder %v3568_v32, %v4115_v43  ;;  %vm5903_vm11 = vcmp.eq.s32.totalorder %v3586_v38, %v4112_v42  ;;  %v4729_v32 = vld [vmem:[#allocation5 + $0x34] ss:$8 sps:$4 sm:$0xff]  }
  0xa8   : > { %3004 = vmatpush1.bf16.msk.msra.mxu0 %vm3003_vm8, %v3397_v41  ;;  %vm3067_vm7 = vmpackc.low %vm5897_vm10, %vm5896_vm1  ;;  %vm5898_vm8 = vcmp.eq.s32.totalorder %v3583_v37, %v4106_v17  ;;  %vm5899_vm1 = vcmp.eq.s32.totalorder %v3586_v38, %v4106_v17 }
  0xa9   : > { %3068 = vmatpush1.bf16.msk.msra.mxu1 %vm3067_vm7, %v3397_v41  ;;  %vm3005_vm10 = vmpackc.low %vm5899_vm1, %vm5898_vm8  ;;  %vm5901_vm8 = vcmp.eq.s32.totalorder %v3586_v38, %v4109_v40 }
  0xaa   : > { %3006 = vmatprep.subr.msk.bf16.mxu0 %vm3005_vm10, %v3397_v41  ;;  %vm3069_vm1 = vmpackc.low %vm5901_vm8, %vm5900_vm6  ;;  %vm5904_vm10 = vcmp.eq.s32.totalorder %v3583_v37, %v4115_v43  ;;  %vm5905_vm6 = vcmp.eq.s32.totalorder %v3586_v38, %v4115_v43  ;;  %v4849_v37 = vld [vmem:[#allocation5 + $0x54] ss:$8 sps:$4 sm:$0xff]   ;;  %v4897_v38 = vld [vmem:[#allocation5 + $0x50] ss:$8 sps:$4 sm:$0xff]  }
  0xab   : > { %1438 = vmatmul.mubr.bf16.gmra.mxu0 %v4625_v25  ;;  %3070 = vmatprep.subr.msk.bf16.mxu1 %vm3069_vm1, %v3397_v41  ;;  %vm3007_vm7 = vmpackc.low %vm5903_vm11, %vm5902_vm3  ;;  %vm5906_vm1 = vcmp.eq.s32.totalorder %v3627_v44, %v4106_v17  ;;  %vm5908_vm11 = vcmp.eq.s32.totalorder %v3627_v44, %v4109_v40 }
  0xac   : > { %1551 = vmatmul.mubr.bf16.gmra.mxu1 %v4625_v25  ;;  %3008 = vmatpush1.bf16.msk.msra.mxu0 %vm3007_vm7, %v3397_v41  ;;  %vm3071_vm8 = vmpackc.low %vm5905_vm6, %vm5904_vm10  ;;  %vm5909_vm7 = vcmp.eq.s32.totalorder %v3630_v45, %v4109_v40  ;;  %vm5910_vm6 = vcmp.eq.s32.totalorder %v3627_v44, %v4112_v42 }
  0xad   : > { %3072 = vmatpush1.bf16.msk.msra.mxu1 %vm3071_vm8, %v3397_v41  ;;  %vm3009_vm3 = vmpackc.low %vm5907_vm2, %vm5906_vm1  ;;  %1447 = vmatprep.mubr.bf16.mxu0 %v4657_v26  ;;  %vm5911_vm2 = vcmp.eq.s32.totalorder %v3630_v45, %v4112_v42  ;;  %vm5912_vm1 = vcmp.eq.s32.totalorder %v3627_v44, %v4115_v43  ;;  %v4913_v44 = vld [vmem:[#allocation5 + $0x64] ss:$8 sps:$4 sm:$0xff]  }
  0xae   : > { %3010 = vmatprep.subr.msk.bf16.mxu0 %vm3009_vm3, %v3397_v41  ;;  %vm3073_vm10 = vmpackc.low %vm5909_vm7, %vm5908_vm11  ;;  %1560 = vmatprep.mubr.bf16.mxu1 %v4657_v26  ;;  %vm5913_vm3 = vcmp.eq.s32.totalorder %v3630_v45, %v4115_v43  ;;  %vm5914_vm7 = vcmp.eq.s32.totalorder %v3654_v48, %v4106_v17  ;;  %v4961_v45 = vld [vmem:[#allocation5 + $0x60] ss:$8 sps:$4 sm:$0xff]  }
  0xaf   : > { %3074 = vmatprep.subr.msk.bf16.mxu1 %vm3073_vm10, %v3397_v41  ;;  %vm3011_vm8 = vmpackc.low %vm5911_vm2, %vm5910_vm6  ;;  %vm5915_vm10 = vcmp.eq.s32.totalorder %v3662_v49, %v4106_v17  ;;  %vm5916_vm2 = vcmp.eq.s32.totalorder %v3654_v48, %v4109_v40 }
  0xb0   : > { %3012 = vmatpush1.bf16.msk.msra.mxu0 %vm3011_vm8, %v3397_v41  ;;  %vm3075_vm11 = vmpackc.low %vm5913_vm3, %vm5912_vm1  ;;  %vm5917_vm8 = vcmp.eq.s32.totalorder %v3662_v49, %v4109_v40  ;;  %vm5918_vm3 = vcmp.eq.s32.totalorder %v3654_v48, %v4112_v42 }
  0xb1   : > { %3076 = vmatpush1.bf16.msk.msra.mxu1 %vm3075_vm11, %v3397_v41  ;;  %vm3013_vm6 = vmpackc.low %vm5915_vm10, %vm5914_vm7  ;;  %vm5919_vm11 = vcmp.eq.s32.totalorder %v3662_v49, %v4112_v42  ;;  %vm5920_vm10 = vcmp.eq.s32.totalorder %v3654_v48, %v4115_v43  ;;  %v3264_v48 = vld [vmem:[#allocation5 + $0x4] ss:$8 sps:$4 sm:$0xff]  }
  0xb2   : > { %3014 = vmatprep.subr.msk.bf16.mxu0 %vm3013_vm6, %v3397_v41  ;;  %vm3077_vm1 = vmpackc.low %vm5917_vm8, %vm5916_vm2  ;;  %vm5921_vm6 = vcmp.eq.s32.totalorder %v3662_v49, %v4115_v43  ;;  %vm5922_vm8 = vcmp.eq.s32.totalorder %v3665_v50, %v4106_v17 }
  0xb3   : > { %1448 = vmatmul.mubr.bf16.gmra.mxu0 %v4713_v31  ;;  %3078 = vmatprep.subr.msk.bf16.mxu1 %vm3077_vm1, %v3397_v41  ;;  %vm3015_vm7 = vmpackc.low %vm5919_vm11, %vm5918_vm3  ;;  %vm5923_vm1 = vcmp.eq.s32.totalorder %v3684_v53, %v4106_v17  ;;  %vm5924_vm11 = vcmp.eq.s32.totalorder %v3665_v50, %v4109_v40 }
  0xb4   : > { %1561 = vmatmul.mubr.bf16.gmra.mxu1 %v4713_v31  ;;  %3016 = vmatpush1.bf16.msk.msra.mxu0 %vm3015_vm7, %v3397_v41  ;;  %vm3079_vm2 = vmpackc.low %vm5921_vm6, %vm5920_vm10  ;;  %vm5925_vm7 = vcmp.eq.s32.totalorder %v3684_v53, %v4109_v40  ;;  %vm5926_vm6 = vcmp.eq.s32.totalorder %v3665_v50, %v4112_v42 }
  0xb5   : > { %3080 = vmatpush1.bf16.msk.msra.mxu1 %vm3079_vm2, %v3397_v41  ;;  %vm3017_vm3 = vmpackc.low %vm5923_vm1, %vm5922_vm8  ;;  %1457 = vmatprep.mubr.bf16.mxu0 %v4729_v32  ;;  %vm5927_vm2 = vcmp.eq.s32.totalorder %v3684_v53, %v4112_v42  ;;  %vm5928_vm1 = vcmp.eq.s32.totalorder %v3665_v50, %v4115_v43 }
  0xb6   : > { %3018 = vmatprep.subr.msk.bf16.mxu0 %vm3017_vm3, %v3397_v41  ;;  %vm3081_vm10 = vmpackc.low %vm5925_vm7, %vm5924_vm11  ;;  %1570 = vmatprep.mubr.bf16.mxu1 %v4729_v32  ;;  %vm5929_vm3 = vcmp.eq.s32.totalorder %v3684_v53, %v4115_v43  ;;  %vm5930_vm7 = vcmp.eq.s32.totalorder %v3687_v54, %v4106_v17 }
  0xb7   : > { %3082 = vmatprep.subr.msk.bf16.mxu1 %vm3081_vm10, %v3397_v41  ;;  %vm3019_vm8 = vmpackc.low %vm5927_vm2, %vm5926_vm6  ;;  %vm5931_vm10 = vcmp.eq.s32.totalorder %v3701_v55, %v4106_v17  ;;  %vm5932_vm2 = vcmp.eq.s32.totalorder %v3687_v54, %v4109_v40 }
  0xb8   : > { %3020 = vmatpush1.bf16.msk.msra.mxu0 %vm3019_vm8, %v3397_v41  ;;  %vm3083_vm11 = vmpackc.low %vm5929_vm3, %vm5928_vm1  ;;  %vm5933_vm8 = vcmp.eq.s32.totalorder %v3701_v55, %v4109_v40  ;;  %vm408_vm3 = vcmp.eq.s32.totalorder %v3538_v12, %v4106_v17 }
  0xb9   : > { %3084 = vmatpush1.bf16.msk.msra.mxu1 %vm3083_vm11, %v3397_v41  ;;  %vm3021_vm6 = vmpackc.low %vm5931_vm10, %vm5930_vm7  ;;  %vm416_vm11 = vcmp.eq.s32.totalorder %v3704_v56, %v4106_v17  ;;  %vm5934_vm7 = vcmp.eq.s32.totalorder %v3687_v54, %v4112_v42  ;;  %vm5935_vm10 = vcmp.eq.s32.totalorder %v3701_v55, %v4112_v42 }
  0xba   : > { %3022 = vmatprep.subr.msk.bf16.mxu0 %vm3021_vm6, %v3397_v41  ;;  %vm3085_vm1 = vmpackc.low %vm5933_vm8, %vm5932_vm2  ;;  %vm410_vm2 = vcmp.eq.s32.totalorder %v3538_v12, %v4109_v40  ;;  %vm418_vm8 = vcmp.eq.s32.totalorder %v3704_v56, %v4109_v40 }
  0xbb   : > { %1458 = vmatmul.mubr.bf16.gmra.mxu0 %v4777_v34  ;;  %3086 = vmatprep.subr.msk.bf16.mxu1 %vm3085_vm1, %v3397_v41  ;;  %vm3023_vm6 = vmpackc.low %vm5935_vm10, %vm5934_vm7  ;;  %vm5936_vm1 = vcmp.eq.s32.totalorder %v3687_v54, %v4115_v43  ;;  %vm407_vm7 = vcmp.eq.s32.totalorder %v3538_v12, %v4112_v42  ;;  %vm415_vm10 = vcmp.eq.s32.totalorder %v3704_v56, %v4112_v42 }
  0xbc   : > { %1571 = vmatmul.mubr.bf16.gmra.mxu1 %v4777_v34  ;;  %3024 = vmatpush1.bf16.msk.msra.mxu0 %vm3023_vm6, %v3397_v41  ;;  %vm3087_vm14 = vmpackc.low %vm5937_vm0, %vm5936_vm1  ;;  %vm417_vm6 = vcmp.eq.s32.totalorder %v3704_v56, %v4115_v43 }
  0xbd   : > { %3088 = vmatpush1.bf16.msk.msra.mxu1 %vm3087_vm14, %v3397_v41  ;;  %vm3025_vm9 = vmpackc.low %vm416_vm11, %vm408_vm3  ;;  %1467 = vmatprep.mubr.bf16.mxu0 %v4793_v35  ;;  %vm5938_vm3 = vcmp.eq.s32.totalorder %v3718_v57, %v4109_v40  ;;  %vm5939_vm11 = vcmp.eq.s32.totalorder %v3721_v58, %v4109_v40 }
  0xbe   : > { %3026 = vmatprep.subr.msk.bf16.mxu0 %vm3025_vm9, %v3397_v41  ;;  %vm3089_vm0 = vmpackc.low %vm418_vm8, %vm410_vm2  ;;  %1580 = vmatprep.mubr.bf16.mxu1 %v4793_v35  ;;  %vm5940_vm2 = vcmp.eq.s32.totalorder %v3718_v57, %v4112_v42  ;;  %vm5942_vm8 = vcmp.eq.s32.totalorder %v3718_v57, %v4115_v43 }
  0xbf   : > { %3090 = vmatprep.subr.msk.bf16.mxu1 %vm3089_vm0, %v3397_v41  ;;  %vm3027_vm1 = vmpackc.low %vm415_vm10, %vm407_vm7  ;;  %vm5943_vm7 = vcmp.eq.s32.totalorder %v3721_v58, %v4115_v43 }
  0xc0   : > { %3028 = vmatpush1.bf16.msk.msra.mxu0 %vm3027_vm1, %v3397_v41  ;;  %vm3091_vm14 = vmpackc.low %vm417_vm6, %vm409_vm12  ;;  %vm5944_vm6 = vcmp.eq.s32.totalorder %v3749_v62, %v4106_v17  ;;  %vm5945_vm1 = vcmp.eq.s32.totalorder %v3746_v61, %v4109_v40 }
  0xc1   : > { %3092 = vmatpush1.bf16.msk.msra.mxu1 %vm3091_vm14, %v3397_v41  ;;  %vm3029_vm9 = vmpackc.low %vm656_vm15, %vm648_vm13  ;;  %vm5941_vm13 = vcmp.eq.s32.totalorder %v3721_v58, %v4112_v42  ;;  %vm5946_vm14 = vcmp.eq.s32.totalorder %v3749_v62, %v4109_v40 }
  0xc2   : > { %3030 = vmatprep.subr.msk.bf16.mxu0 %vm3029_vm9, %v3397_v41  ;;  %vm3093_vm12 = vmpackc.low %vm5939_vm11, %vm5938_vm3  ;;  %vm5948_vm11 = vcmp.eq.s32.totalorder %v3746_v61, %v4115_v43 }
  0xc3   : > { %1468 = vmatmul.mubr.bf16.gmra.mxu0 %v4839_v36  ;;  %3094 = vmatprep.subr.msk.bf16.mxu1 %vm3093_vm12, %v3397_v41  ;;  %vm3031_vm15 = vmpackc.low %vm5941_vm13, %vm5940_vm2  ;;  %vm5949_vm12 = vcmp.eq.s32.totalorder %v3749_v62, %v4115_v43  ;;  %vm5950_vm13 = vcmp.eq.s32.totalorder %v3763_v63, %v4106_v17 }
  0xc4   : > { %1581 = vmatmul.mubr.bf16.gmra.mxu1 %v4839_v36  ;;  %3032 = vmatpush2.bf16.msk.msra.mxu0 %vm3031_vm15, %v3397_v41  ;;  %vm3095_vm10 = vmpackc.low %vm5943_vm7, %vm5942_vm8  ;;  %vm5951_vm15 = vcmp.eq.s32.totalorder %v3766_v0, %v4106_v17  ;;  %vm5952_vm8 = vcmp.eq.s32.totalorder %v3763_v63, %v4109_v40  ;;  %vm5953_vm7 = vcmp.eq.s32.totalorder %v3766_v0, %v4109_v40 }
  0xc5   : > { %3096 = vmatpush2.bf16.msk.msra.mxu1 %vm3095_vm10, %v3397_v41  ;;  %vm3033_vm0 = vmpackc.low %vm5944_vm6, %vm632_vm5  ;;  %1477 = vmatprep.mubr.bf16.mxu0 %v4849_v37  ;;  %vm5947_vm5 = vcmp.eq.s32.totalorder %v3749_v62, %v4112_v42  ;;  %vm5954_vm6 = vcmp.eq.s32.totalorder %v3763_v63, %v4112_v42 }
  0xc6   : > { %3034 = vmatprep.subr.msk.bf16.mxu0 %vm3033_vm0, %v3397_v41  ;;  %vm3097_vm9 = vmpackc.low %vm5946_vm14, %vm5945_vm1  ;;  %1590 = vmatprep.mubr.bf16.mxu1 %v4849_v37  ;;  %vm5955_vm0 = vcmp.eq.s32.totalorder %v3766_v0, %v4112_v42  ;;  %vm5956_vm14 = vcmp.eq.s32.totalorder %v3763_v63, %v4115_v43 }
  0xc7   : > { %3098 = vmatprep.subr.msk.bf16.mxu1 %vm3097_vm9, %v3397_v41  ;;  %vm3035_vm3 = vmpackc.low %vm5947_vm5, %vm631_vm4  ;;  %vm5957_vm9 = vcmp.eq.s32.totalorder %v3766_v0, %v4115_v43 }
  0xc8   : > { %3036 = vmatpush2.bf16.msk.msra.mxu0 %vm3035_vm3, %v3397_v41  ;;  %vm3099_vm2 = vmpackc.low %vm5949_vm12, %vm5948_vm11  ;;  %vm5958_vm3 = vcmp.eq.s32.totalorder %v3780_v1, %v4106_v17  ;;  %vm5959_vm11 = vcmp.eq.s32.totalorder %v3783_v2, %v4106_v17 }
  0xc9   : > { %3100 = vmatpush2.bf16.msk.msra.mxu1 %vm3099_vm2, %v3397_v41  ;;  %vm3037_vm4 = vmpackc.low %vm5951_vm15, %vm5950_vm13  ;;  %vm5960_vm2 = vcmp.eq.s32.totalorder %v3780_v1, %v4109_v40  ;;  %vm5961_vm13 = vcmp.eq.s32.totalorder %v3783_v2, %v4109_v40 }
  0xca   : > { %3038 = vmatprep.subr.msk.bf16.mxu0 %vm3037_vm4, %v3397_v41  ;;  %vm3101_vm10 = vmpackc.low %vm5953_vm7, %vm5952_vm8  ;;  %vm5962_vm4 = vcmp.eq.s32.totalorder %v3780_v1, %v4112_v42  ;;  %vm5963_vm8 = vcmp.eq.s32.totalorder %v3783_v2, %v4112_v42 }
  0xcb   : > { %1478 = vmatmul.mubr.bf16.gmra.mxu0 %v4897_v38  ;;  %3102 = vmatprep.subr.msk.bf16.mxu1 %vm3101_vm10, %v3397_v41  ;;  %vm3039_vm1 = vmpackc.low %vm5955_vm0, %vm5954_vm6  ;;  %vm5964_vm10 = vcmp.eq.s32.totalorder %v3780_v1, %v4115_v43  ;;  %vm5965_vm6 = vcmp.eq.s32.totalorder %v3783_v2, %v4115_v43  ;;  %v3265_v1 = vld [vmem:[%s3526_s22] sm:$0x77] }
  0xcc   : > { %1591 = vmatmul.mubr.bf16.gmra.mxu1 %v4897_v38  ;;  %3040 = vmatpush2.bf16.msk.msra.mxu0 %vm3039_vm1, %v3397_v41  ;;  %vm3103_vm5 = vmpackc.low %vm5957_vm9, %vm5956_vm14  ;;  %vm5966_vm1 = vcmp.eq.s32.totalorder %v3808_v3, %v4106_v17  ;;  %vm5967_vm14 = vcmp.eq.s32.totalorder %v3811_v4, %v4106_v17  ;;  %v181_v2 = vand.u32 2147483647, %v3265_v1 }
  0xcd   : > { %3104 = vmatpush2.bf16.msk.msra.mxu1 %vm3103_vm5, %v3397_v41  ;;  %vm3041_vm12 = vmpackc.low %vm5959_vm11, %vm5958_vm3  ;;  %1487 = vmatprep.mubr.bf16.mxu0 %v4913_v44  ;;  %vm5968_vm5 = vcmp.eq.s32.totalorder %v3808_v3, %v4109_v40  ;;  %vm5969_vm3 = vcmp.eq.s32.totalorder %v3811_v4, %v4109_v40 }
  0xce   : > { %3042 = vmatprep.subr.msk.bf16.mxu0 %vm3041_vm12, %v3397_v41  ;;  %vm3105_vm15 = vmpackc.low %vm5961_vm13, %vm5960_vm2  ;;  %1600 = vmatprep.mubr.bf16.mxu1 %v4913_v44  ;;  %vm5970_vm12 = vcmp.eq.s32.totalorder %v3808_v3, %v4112_v42  ;;  %vm5971_vm2 = vcmp.eq.s32.totalorder %v3811_v4, %v4112_v42  ;;  %v189_v27 = vcombine.high %v181_v2, %v181_v2 }
  0xcf   : > { %3106 = vmatprep.subr.msk.bf16.mxu1 %vm3105_vm15, %v3397_v41  ;;  %vm3043_vm7 = vmpackc.low %vm5963_vm8, %vm5962_vm4  ;;  %vm5972_vm15 = vcmp.eq.s32.totalorder %v3808_v3, %v4115_v43  ;;  %vm5973_vm4 = vcmp.eq.s32.totalorder %v3811_v4, %v4115_v43 }
  0xd0   : > { %3044 = vmatpush2.bf16.msk.msra.mxu0 %vm3043_vm7, %v3397_v41  ;;  %vm3107_vm0 = vmpackc.low %vm5965_vm6, %vm5964_vm10  ;;  %vm5974_vm7 = vcmp.eq.s32.totalorder %v3825_v5, %v4106_v17  ;;  %vm5975_vm10 = vcmp.eq.s32.totalorder %v3828_v6, %v4106_v17 }
  0xd1   : > { %3108 = vmatpush2.bf16.msk.msra.mxu1 %vm3107_vm0, %v3397_v41  ;;  %vm3045_vm9 = vmpackc.low %vm5967_vm14, %vm5966_vm1  ;;  %vm5976_vm0 = vcmp.eq.s32.totalorder %v3825_v5, %v4109_v40  ;;  %vm5977_vm1 = vcmp.eq.s32.totalorder %v3828_v6, %v4109_v40 }
  0xd2   : > { %3046 = vmatprep.subr.msk.bf16.mxu0 %vm3045_vm9, %v3397_v41  ;;  %vm3109_vm11 = vmpackc.low %vm5969_vm3, %vm5968_vm5  ;;  %vm5978_vm9 = vcmp.eq.s32.totalorder %v3825_v5, %v4112_v42  ;;  %vm5979_vm5 = vcmp.eq.s32.totalorder %v3828_v6, %v4112_v42 }
  0xd3   : > { %1488 = vmatmul.mubr.bf16.gmra.mxu0 %v4961_v45  ;;  %3110 = vmatprep.subr.msk.bf16.mxu1 %vm3109_vm11, %v3397_v41  ;;  %vm3047_vm13 = vmpackc.low %vm5971_vm2, %vm5970_vm12  ;;  %vm5980_vm11 = vcmp.eq.s32.totalorder %v3825_v5, %v4115_v43  ;;  %vm5981_vm12 = vcmp.eq.s32.totalorder %v3828_v6, %v4115_v43  ;;  %v3266_v6 = vld [vmem:[%s3526_s22 + $0x8] sm:$0x77] }
  0xd4   : > { %1601 = vmatmul.mubr.bf16.gmra.mxu1 %v4961_v45  ;;  %3048 = vmatpush2.bf16.msk.msra.mxu0 %vm3047_vm13, %v3397_v41  ;;  %vm3111_vm8 = vmpackc.low %vm5973_vm4, %vm5972_vm15  ;;  %vm5982_vm13 = vcmp.eq.s32.totalorder %v3859_v9, %v4106_v17  ;;  %vm5983_vm15 = vcmp.eq.s32.totalorder %v3862_v10, %v4106_v17  ;;  %v182_v7 = vand.u32 2147483647, %v3266_v6 }
  0xd5   : > { %3112 = vmatpush2.bf16.msk.msra.mxu1 %vm3111_vm8, %v3397_v41  ;;  %vm3049_vm6 = vmpackc.low %vm5975_vm10, %vm5974_vm7  ;;  %1497 = vmatprep.mubr.bf16.mxu0 %v4977_v46  ;;  %vm5984_vm8 = vcmp.eq.s32.totalorder %v3859_v9, %v4109_v40  ;;  %vm5985_vm7 = vcmp.eq.s32.totalorder %v3862_v10, %v4109_v40 }
  0xd6   : > { %3050 = vmatprep.subr.msk.bf16.mxu0 %vm3049_vm6, %v3397_v41  ;;  %vm3113_vm14 = vmpackc.low %vm5977_vm1, %vm5976_vm0  ;;  %1610 = vmatprep.mubr.bf16.mxu1 %v4977_v46  ;;  %vm5986_vm6 = vcmp.eq.s32.totalorder %v3859_v9, %v4112_v42  ;;  %vm5987_vm0 = vcmp.eq.s32.totalorder %v3862_v10, %v4112_v42  ;;  %v190_v28 = vcombine.high %v182_v7, %v182_v7 }
  0xd7   : > { %3114 = vmatprep.subr.msk.bf16.mxu1 %vm3113_vm14, %v3397_v41  ;;  %vm3051_vm3 = vmpackc.low %vm5979_vm5, %vm5978_vm9  ;;  %vm5988_vm14 = vcmp.eq.s32.totalorder %v3859_v9, %v4115_v43  ;;  %vm5989_vm9 = vcmp.eq.s32.totalorder %v3862_v10, %v4115_v43 }
  0xd8   : > { %3052 = vmatpush2.bf16.msk.msra.mxu0 %vm3051_vm3, %v3397_v41  ;;  %vm3115_vm2 = vmpackc.low %vm5981_vm12, %vm5980_vm11  ;;  %vm5990_vm3 = vcmp.eq.s32.totalorder %v3876_v11, %v4106_v17  ;;  %vm5991_vm11 = vcmp.eq.s32.totalorder %v3879_v13, %v4106_v17 }
  0xd9   : > { %3116 = vmatpush2.bf16.msk.msra.mxu1 %vm3115_vm2, %v3397_v41  ;;  %vm3053_vm4 = vmpackc.low %vm5983_vm15, %vm5982_vm13  ;;  %vm5992_vm2 = vcmp.eq.s32.totalorder %v3876_v11, %v4109_v40  ;;  %vm5993_vm13 = vcmp.eq.s32.totalorder %v3879_v13, %v4109_v40 }
  0xda   : > { %3054 = vmatprep.subr.msk.bf16.mxu0 %vm3053_vm4, %v3397_v41  ;;  %vm3117_vm10 = vmpackc.low %vm5985_vm7, %vm5984_vm8  ;;  %vm5994_vm4 = vcmp.eq.s32.totalorder %v3876_v11, %v4112_v42  ;;  %vm5995_vm8 = vcmp.eq.s32.totalorder %v3879_v13, %v4112_v42 }
  0xdb   : > { %1498 = vmatmul.mubr.bf16.gmra.mxu0 %v3231_v47  ;;  %3118 = vmatprep.subr.msk.bf16.mxu1 %vm3117_vm10, %v3397_v41  ;;  %vm3055_vm1 = vmpackc.low %vm5987_vm0, %vm5986_vm6  ;;  %vm5996_vm10 = vcmp.eq.s32.totalorder %v3876_v11, %v4115_v43  ;;  %vm5997_vm6 = vcmp.eq.s32.totalorder %v3879_v13, %v4115_v43  ;;  %v5165_v13 = vsub.s32 2, %v3538_v12 }
  0xdc   : > { %1611 = vmatmul.mubr.bf16.gmra.mxu1 %v3231_v47  ;;  %3056 = vmatpush2.bf16.msk.msra.mxu0 %vm3055_vm1, %v3397_v41  ;;  %vm3119_vm5 = vmpackc.low %vm5989_vm9, %vm5988_vm14  ;;  %vm197_vm1 = vcmask 1042432  }
  0xdd   : > { %3120 = vmatpush2.bf16.msk.msra.mxu1 %vm3119_vm5, %v3397_v41  ;;  %vm3057_vm12 = vmpackc.low %vm5991_vm11, %vm5990_vm3  ;;  %1653 = vmatprep.mubr.bf16.mxu0 %v3264_v48  ;;  %v198_v9 = vsel %vm197_vm1, %v181_v2, -inf  ;;  %v212_v22 = vsel %vm197_vm1, %v182_v7, -inf  ;;  %v1914_v39 = vrot.slane %v3540_v15, %v5165_v13  ;;  %v1922_v42 = vrot.slane %v3548_v18, %v5165_v13 }
  0xde   : > { %3058 = vmatprep.subr.msk.bf16.mxu0 %vm3057_vm12, %v3397_v41  ;;  %vm3121_vm15 = vmpackc.low %vm5993_vm13, %vm5992_vm2  ;;  %1766 = vmatprep.mubr.bf16.mxu1 %v3264_v48  ;;  %v199_v21 = vrot.slane %v198_v9, 4  ;;  %v213_v17 = vrot.slane %v212_v22, 4 }
  0xdf   : > { %3122 = vmatprep.subr.msk.bf16.mxu1 %vm3121_vm15, %v3397_v41  ;;  %vm3059_vm7 = vmpackc.low %vm5995_vm8, %vm5994_vm4  ;;  %vm2359_vm15 = vcmask 1041409   ;;  %vm2361_vm4 = vcmask 1042434   ;;  %vm2363_vm8 = vcmask 1043459  }
  0xe0   : > { %3060 = vmatpush2.bf16.msk.msra.mxu0 %vm3059_vm7, %v3397_v41  ;;  %vm3123_vm0 = vmpackc.low %vm5997_vm6, %vm5996_vm10  ;;  %v200_v43 = vmax.f32 %v198_v9, %v199_v21 }
  0xe1   : > { %3124 = vmatpush2.bf16.msk.msra.mxu1 %vm3123_vm0, %v3397_v41 }
  0xe3   : > { %1654 = vmatmul.mubr.bf16.vlgmr.msra.gmra.mxu0 %v4505_v16 }
  0xe4   : > { %1767 = vmatmul.mubr.bf16.vlgmr.msra.gmra.mxu1 %v4505_v16  ;;  %1663 = vmatprep.mubr.bf16.mxu0 %v4537_v33 }
  0xe5   : > { %1776 = vmatprep.mubr.bf16.mxu1 %v4537_v33  ;;  %v1918_v33 = vrot.slane %v3540_v15, %v5173_v24  ;;  %v201_v15 = vrot.slane %v200_v43, 2 }
  0xe7   : > { %v5217_v7 = vmax.f32 %v200_v43, %v201_v15 }
  0xeb   : > { %1664 = vmatmul.mubr.bf16.gmra.mxu0 %v4625_v25 }
  0xec   : > { %1777 = vmatmul.mubr.bf16.gmra.mxu1 %v4625_v25  ;;  %1673 = vmatprep.mubr.bf16.mxu0 %v4657_v26  ;;  %v1926_v25 = vrot.slane %v3548_v18, %v5173_v24 }
  0xed   : > { %1786 = vmatprep.mubr.bf16.mxu1 %v4657_v26  ;;  %v205_v26 = vsel %vm197_vm1, %v189_v27, -inf }
  0xf3   : > { %1674 = vmatmul.mubr.bf16.gmra.mxu0 %v4713_v31 }
  0xf4   : > { %1787 = vmatmul.mubr.bf16.gmra.mxu1 %v4713_v31  ;;  %1683 = vmatprep.mubr.bf16.mxu0 %v4729_v32  ;;  %v219_v31 = vsel %vm197_vm1, %v190_v28, -inf }
  0xf5   : > { %1796 = vmatprep.mubr.bf16.mxu1 %v4729_v32  ;;  %v220_v18 = vrot.slane %v219_v31, 4 }
  0xf7   : > { %v5221_v21 = vmax.f32 %v219_v31, %v220_v18 }
  0xfb   : > { %1684 = vmatmul.mubr.bf16.gmra.mxu0 %v4777_v34 }
  0xfc   : > { %1797 = vmatmul.mubr.bf16.gmra.mxu1 %v4777_v34  ;;  %1693 = vmatprep.mubr.bf16.mxu0 %v4793_v35 }
  0xfd   : > { %1806 = vmatprep.mubr.bf16.mxu1 %v4793_v35  ;;  %v5198_v35 = vrot.slane %v1914_v39, %v5165_v13 }
  0xff   : > { %vm1975_vm14 = vcmp.eq.s32.totalorder %v3538_v12, %v5198_v35  ;;  %vm1983_vm11 = vcmp.eq.s32.totalorder %v3704_v56, %v5198_v35 }
 0x103   : > { %1694 = vmatmul.mubr.bf16.gmra.mxu0 %v4839_v36 }
 0x104   : > { %1807 = vmatmul.mubr.bf16.gmra.mxu1 %v4839_v36  ;;  %1703 = vmatprep.mubr.bf16.mxu0 %v4849_v37  ;;  %v214_v36 = vmax.f32 %v212_v22, %v213_v17 }
 0x105   : > { %1816 = vmatprep.mubr.bf16.mxu1 %v4849_v37 }
 0x106   : > { %v215_v2 = vrot.slane %v214_v36, 2 }
 0x108   : > { %v5240_v43 = vmax.f32 %v214_v36, %v215_v2 }
 0x10b   : > { %1704 = vmatmul.mubr.bf16.gmra.mxu0 %v4897_v38 }
 0x10c   : > { %1817 = vmatmul.mubr.bf16.gmra.mxu1 %v4897_v38  ;;  %1713 = vmatprep.mubr.bf16.mxu0 %v4913_v44  ;;  %v5203_v38 = vrot.slane %v1922_v42, %v5165_v13 }
 0x10d   : > { %1826 = vmatprep.mubr.bf16.mxu1 %v4913_v44  ;;  %v206_v44 = vrot.slane %v205_v26, 4 }
 0x10e   : > { %vm1977_vm9 = vcmp.eq.s32.totalorder %v3538_v12, %v5203_v38  ;;  %vm1985_vm12 = vcmp.eq.s32.totalorder %v3704_v56, %v5203_v38 }
 0x10f   : > { %v5219_v9 = vmax.f32 %v205_v26, %v206_v44 }
 0x113   : > { %1714 = vmatmul.mubr.bf16.gmra.mxu0 %v4961_v45 }
 0x114   : > { %1827 = vmatmul.mubr.bf16.gmra.mxu1 %v4961_v45  ;;  %1723 = vmatprep.mubr.bf16.mxu0 %v4977_v46 }
 0x115   : > { %1836 = vmatprep.mubr.bf16.mxu1 %v4977_v46  ;;  %v5208_v46 = vrot.slane %v1918_v33, %v5165_v13 }
 0x117   : > { %vm1976_vm5 = vcmp.eq.s32.totalorder %v3538_v12, %v5208_v46  ;;  %vm1984_vm2 = vcmp.eq.s32.totalorder %v3704_v56, %v5208_v46 }
 0x11b   : > { %1724 = vmatmul.mubr.bf16.gmra.mxu0 %v3231_v47 }
 0x11c   : > { %1837 = vmatmul.mubr.bf16.gmra.mxu1 %v3231_v47  ;;  %v5211_v47 = vrot.slane %v1926_v25, %v5165_v13 }
 0x11e   : > { %vm1978_vm3 = vcmp.eq.s32.totalorder %v3538_v12, %v5211_v47  ;;  %vm1986_vm13 = vcmp.eq.s32.totalorder %v3704_v56, %v5211_v47 }
 0x163   : > { %v5117_v41 = vpop.f32.mrf.mxu0 }
 0x164   : > { %v5119_v49 = vpop.f32.mrf.mxu1 }
 0x165   : > { %v5121_v50 = vpop.f32.mrf.mxu0 }
 0x166   : > { %v5123_v51 = vpop.f32.mrf.mxu1 }
 0x167   : > { %v5125_v52 = vpop.f32.mrf.mxu0 }
 0x168   : > { %v5127_v53 = vpop.f32.mrf.mxu1 }
 0x169   : > { %v5129_v54 = vpop.f32.mrf.mxu0 }
 0x16a   : > { %v5131_v55 = vpop.f32.mrf.mxu1 }
 0x16b   : > { %v5133_v57 = vpop.f32.mrf.mxu0 }
 0x16c   : > { %v5135_v58 = vpop.f32.mrf.mxu1 }
 0x16d   : > { %v5137_v59 = vpop.f32.mrf.mxu0 }
 0x16e   : > { %v5139_v60 = vpop.f32.mrf.mxu1 }
 0x16f   : > { %v5141_v61 = vpop.f32.mrf.mxu0 }
 0x170   : > { %v5143_v62 = vpop.f32.mrf.mxu1 }
 0x171   : > { %v5145_v63 = vpop.f32.mrf.mxu0 }
 0x172   : > { %v5147_v0 = vpop.f32.mrf.mxu1 }
 0x173   : > { %v5150_v3 = vpop.f32.mrf.mxu0 }
 0x174   : > { %v5152_v4 = vpop.f32.mrf.mxu1 }
 0x175   : > { %v5154_v5 = vpop.f32.mrf.mxu0 }
 0x176   : > { %v5157_v8 = vpop.f32.mrf.mxu1 }
 0x177   : > { %v5160_v10 = vpop.f32.mrf.mxu0 }
 0x178   : > { %v5162_v11 = vpop.f32.mrf.mxu1 }
 0x179   : > { %v5167_v20 = vpop.f32.mrf.mxu0 }
 0x17a   : > { %v5170_v23 = vpop.f32.mrf.mxu1 }
 0x17b   : > { %v5175_v29 = vpop.f32.mrf.mxu0 }
 0x17c   : > { %v5177_v30 = vpop.f32.mrf.mxu1 }
 0x17d   : > { %v5181_v40 = vpop.f32.mrf.mxu0 }
 0x17e   : > { %v5185_v16 = vpop.f32.mrf.mxu1 }
 0x17f   : > { %v5193_v32 = vpop.f32.mrf.mxu0 }
 0x180   : > { %v5195_v34 = vpop.f32.mrf.mxu1 }
 0x181   : > { %v5200_v37 = vpop.f32.mrf.mxu0 }
 0x182   : > { %v5205_v45 = vpop.f32.mrf.mxu1 }
 0x183   : > { %v1469_v48 = vpop.f32.mrf.mxu0 }
 0x184   : > { %v1582_v1 = vpop.f32.mrf.mxu1  ;;  %v1847_v22 = vadd.f32 %v1469_v48, %v5117_v41 }
 0x185   : > { %v1471_v6 = vpop.f32.mrf.mxu0  ;;  %v1849_v27 = vadd.f32 %v1582_v1, %v5119_v49 }
 0x186   : > { %v1584_v28 = vpop.f32.mrf.mxu1  ;;  %v1848_v39 = vadd.f32 %v1471_v6, %v5121_v50 }
 0x187   : > { %v1473_v17 = vpop.f32.mrf.mxu0  ;;  %v1850_v41 = vadd.f32 %v1584_v28, %v5123_v51  ;;  %v2023_v51 = vsel %vm1975_vm14, %v1847_v22, 0.0 }
 0x188   : > { %v1855_v49 = vadd.f32 %v1473_v17, %v5125_v52  ;;  %v1586_v42 = vpop.f32.mrf.mxu1  ;;  %v2025_v52 = vsel %vm1977_vm9, %v1849_v27, 0.0  ;;  %v2024_v44 = vsel %vm1976_vm5, %v1848_v39, 0.0 }
 0x189   : > { %v1857_v50 = vadd.f32 %v1586_v42, %v5127_v53  ;;  %v1475_v33 = vpop.f32.mrf.mxu0  ;;  %v2026_v6 = vsel %vm1978_vm3, %v1850_v41, 0.0 }
 0x18a   : > { %v2031_v36 = vsel %vm1983_vm11, %v1855_v49, 0.0  ;;  %v1856_v53 = vadd.f32 %v1475_v33, %v5129_v54  ;;  %v1588_v15 = vpop.f32.mrf.mxu1 }
 0x18b   : > { %v2087_v18 = vadd.f32 %v2031_v36, %v2023_v51  ;;  %v2033_v48 = vsel %vm1985_vm12, %v1857_v50, 0.0  ;;  %v1858_v1 = vadd.f32 %v1588_v15, %v5131_v55  ;;  %v1479_v2 = vpop.f32.mrf.mxu0 }
 0x18c   : > { %v2101_v22 = vadd.f32 %v2033_v48, %v2025_v52  ;;  %v2032_v54 = vsel %vm1984_vm2, %v1856_v53, 0.0  ;;  %v1863_v27 = vadd.f32 %v1479_v2, %v5133_v57  ;;  %v1592_v28 = vpop.f32.mrf.mxu1 }
 0x18d   : > { %v2088_v39 = vrot.slane %v2087_v18, 4  ;;  %v2094_v17 = vadd.f32 %v2032_v54, %v2024_v44  ;;  %v2034_v49 = vsel %vm1986_vm13, %v1858_v1, 0.0  ;;  %v1865_v55 = vadd.f32 %v1592_v28, %v5135_v58  ;;  %v1481_v42 = vpop.f32.mrf.mxu0 }
 0x18e   : > { %v2102_v50 = vrot.slane %v2101_v22, 4  ;;  %v2108_v33 = vadd.f32 %v2034_v49, %v2026_v6  ;;  %v1864_v41 = vadd.f32 %v1481_v42, %v5137_v59  ;;  %v1594_v51 = vpop.f32.mrf.mxu1  ;;  %v2039_v57 = vsel %vm1975_vm14, %v1863_v27, 0.0 }
 0x18f   : > { %v2089_v36 = vadd.f32 %v2088_v39, %v2087_v18  ;;  %v2095_v53 = vrot.slane %v2094_v17, 4  ;;  %v2041_v15 = vsel %vm1977_vm9, %v1865_v55, 0.0  ;;  %v1483_v44 = vpop.f32.mrf.mxu0  ;;  %v1866_v1 = vadd.f32 %v1594_v51, %v5139_v60 }
 0x190   : > { %v2103_v58 = vadd.f32 %v2102_v50, %v2101_v22  ;;  %v2109_v48 = vrot.slane %v2108_v33, 4  ;;  %v1871_v59 = vadd.f32 %v1483_v44, %v5141_v61  ;;  %v1596_v2 = vpop.f32.mrf.mxu1  ;;  %v2040_v18 = vsel %vm1976_vm5, %v1864_v41, 0.0 }
 0x191   : > { %v2090_v6 = vrot.slane %v2089_v36, 2  ;;  %v2096_v54 = vadd.f32 %v2095_v53, %v2094_v17  ;;  %v1873_v27 = vadd.f32 %v1596_v2, %v5143_v62  ;;  %v1485_v28 = vpop.f32.mrf.mxu0 }
 0x192   : > { %v2104_v39 = vrot.slane %v2103_v58, 2  ;;  %v2110_v49 = vadd.f32 %v2109_v48, %v2108_v33  ;;  %v2047_v22 = vsel %vm1983_vm11, %v1871_v59, 0.0  ;;  %v1872_v60 = vadd.f32 %v1485_v28, %v5145_v63  ;;  %v1598_v55 = vpop.f32.mrf.mxu1 }
 0x193   : > { %v2091_v61 = vadd.f32 %v2090_v6, %v2089_v36  ;;  %v2097_v42 = vrot.slane %v2096_v54, 2  ;;  %v2143_v50 = vadd.f32 %v2047_v22, %v2039_v57  ;;  %v2049_v17 = vsel %vm1985_vm12, %v1873_v27, 0.0  ;;  %v1489_v41 = vpop.f32.mrf.mxu0 }
 0x194   : > { %v2105_v51 = vadd.f32 %v2104_v39, %v2103_v58  ;;  %v2111_v62 = vrot.slane %v2110_v49, 2  ;;  %v2157_v53 = vadd.f32 %v2049_v17, %v2041_v15  ;;  %v2048_v33 = vsel %vm1984_vm2, %v1872_v60, 0.0  ;;  %v1602_v44 = vpop.f32.mrf.mxu1 }
 0x195   : > { %v2092_v48 = vrot.slane %v2091_v61, 1  ;;  %v2098_v59 = vadd.f32 %v2097_v42, %v2096_v54  ;;  %v2144_v63 = vrot.slane %v2143_v50, 4  ;;  %v2150_v2 = vadd.f32 %v2048_v33, %v2040_v18  ;;  %v1491_v36 = vpop.f32.mrf.mxu0 }
 0x196   : > { %v2106_v6 = vrot.slane %v2105_v51, 1  ;;  %v5298_v57 = vadd.f32 %v2111_v62, %v2110_v49  ;;  %v2158_v28 = vrot.slane %v2157_v53, 4  ;;  %v1874_v27 = vadd.f32 %v1598_v55, %v5147_v0  ;;  %v1604_v58 = vpop.f32.mrf.mxu1 }
 0x197   : > { %v2099_v39 = vrot.slane %v2098_v59, 1  ;;  %v2042_v15 = vsel %vm1978_vm3, %v1866_v1, 0.0  ;;  %v2145_v22 = vadd.f32 %v2144_v63, %v2143_v50  ;;  %v2151_v60 = vrot.slane %v2150_v2, 4  ;;  %v1493_v17 = vpop.f32.mrf.mxu0 }
 0x198   : > { %v2093_v54 = vadd.f32 %v2092_v48, %v2091_v61  ;;  %v2107_v42 = vadd.f32 %v2106_v6, %v2105_v51  ;;  %v2159_v18 = vadd.f32 %v2158_v28, %v2157_v53  ;;  %v2050_v49 = vsel %vm1986_vm13, %v1874_v27, 0.0  ;;  %v1606_v62 = vpop.f32.mrf.mxu1 }
 0x199   : > { %v2113_v33 = vrot.slane %v5298_v57, 1  ;;  %v2146_v0 = vrot.slane %v2145_v22, 2  ;;  %v2152_v55 = vadd.f32 %v2151_v60, %v2150_v2  ;;  %v2164_v52 = vadd.f32 %v2050_v49, %v2042_v15  ;;  %v1495_v25 = vpop.f32.mrf.mxu0 }
 0x19a   : > { %v2100_v31 = vadd.f32 %v2099_v39, %v2098_v59  ;;  %v2160_v26 = vrot.slane %v2159_v18, 2  ;;  %v1879_v1 = vadd.f32 %v1489_v41, %v5150_v3  ;;  %v1881_v50 = vadd.f32 %v1602_v44, %v5152_v4  ;;  %v1608_v61 = vpop.f32.mrf.mxu1 }
 0x19b   : > { %v2147_v51 = vadd.f32 %v2146_v0, %v2145_v22  ;;  %v2153_v53 = vrot.slane %v2152_v55, 2  ;;  %v2165_v48 = vrot.slane %v2164_v52, 4  ;;  %v1880_v63 = vadd.f32 %v1491_v36, %v5154_v5  ;;  %v1499_v6 = vpop.f32.mrf.mxu0 }
 0x19c   : > { %v2161_v28 = vadd.f32 %v2160_v26, %v2159_v18  ;;  %v2055_v2 = vsel %vm1975_vm14, %v1879_v1, 0.0  ;;  %v2057_v59 = vsel %vm1977_vm9, %v1881_v50, 0.0  ;;  %v1882_v3 = vadd.f32 %v1604_v58, %v5157_v8  ;;  %v1612_v41 = vpop.f32.mrf.mxu1 }
 0x19d   : > { %v2148_v4 = vrot.slane %v2147_v51, 1  ;;  %v2154_v44 = vadd.f32 %v2153_v53, %v2152_v55  ;;  %v2166_v27 = vadd.f32 %v2165_v48, %v2164_v52  ;;  %v2056_v5 = vsel %vm1976_vm5, %v1880_v63, 0.0  ;;  %v1501_v36 = vpop.f32.mrf.mxu0 }
 0x19e   : > { %v2162_v26 = vrot.slane %v2161_v28, 1  ;;  %v2058_v39 = vsel %vm1978_vm3, %v1882_v3, 0.0  ;;  %v1887_v15 = vadd.f32 %v1493_v17, %v5160_v10  ;;  %v1889_v22 = vadd.f32 %v1606_v62, %v5162_v11  ;;  %v5326_v60 = vpop.f32.mrf.mxu1 }
 0x19f   : > { %v2149_v8 = vadd.f32 %v2148_v4, %v2147_v51  ;;  %v2155_v58 = vrot.slane %v2154_v44, 1  ;;  %v2167_v18 = vrot.slane %v2166_v27, 2  ;;  %v1888_v52 = vadd.f32 %v1495_v25, %v5167_v20  ;;  %v1503_v49 = vpop.f32.mrf.mxu0 }
 0x1a0   : > { %v2163_v0 = vadd.f32 %v2162_v26, %v2161_v28  ;;  %v2063_v55 = vsel %vm1983_vm11, %v1887_v15, 0.0  ;;  %v2065_v1 = vsel %vm1985_vm12, %v1889_v22, 0.0  ;;  %v1890_v10 = vadd.f32 %v1608_v61, %v5170_v23  ;;  %v1616_v11 = vpop.f32.mrf.mxu1 }
 0x1a1   : > { %v5337_v17 = vsel %vm2359_vm15, %v2149_v8, %v2093_v54  ;;  %v2156_v62 = vadd.f32 %v2155_v58, %v2154_v44  ;;  %v2168_v50 = vadd.f32 %v2167_v18, %v2166_v27  ;;  %v2199_v51 = vadd.f32 %v2063_v55, %v2055_v2  ;;  %v1505_v20 = vpop.f32.mrf.mxu0 }
 0x1a2   : > { %v5340_v25 = vsel %vm2359_vm15, %v2163_v0, %v2107_v42  ;;  %v2213_v53 = vadd.f32 %v2065_v1, %v2057_v59  ;;  %v2064_v48 = vsel %vm1984_vm2, %v1888_v52, 0.0  ;;  %v2066_v23 = vsel %vm1986_vm13, %v1890_v10, 0.0  ;;  %v1618_v61 = vpop.f32.mrf.mxu1 }
 0x1a3   : > { %v5349_v54 = vsel %vm2359_vm15, %v2156_v62, %v2100_v31  ;;  %v2169_v63 = vrot.slane %v2168_v50, 1  ;;  %v2200_v28 = vrot.slane %v2199_v51, 4  ;;  %v2206_v2 = vadd.f32 %v2064_v48, %v2056_v5  ;;  %v5351_v3 = vpop.f32.mrf.mxu0 }
 0x1a4   : > { %v2214_v42 = vrot.slane %v2213_v53, 4  ;;  %v2220_v4 = vadd.f32 %v2066_v23, %v2058_v39  ;;  %v5998_v59 = vrot.slane %v5219_v9, 2  ;;  %v5999_v27 = vrot.slane %v5221_v21, 2  ;;  %v5359_v15 = vpop.f32.mrf.mxu1 }
 0x1a5   : > { %v2114_v31 = vadd.f32 %v2113_v33, %v5298_v57  ;;  %v2170_v22 = vadd.f32 %v2169_v63, %v2168_v50  ;;  %v2201_v8 = vadd.f32 %v2200_v28, %v2199_v51  ;;  %v2207_v58 = vrot.slane %v2206_v2, 4  ;;  %v5362_v5 = vpop.f32.mrf.mxu0 }
 0x1a6   : > { %v209_v44 = vmax.f32 %v5219_v9, %v5998_v59  ;;  %v223_v26 = vmax.f32 %v5221_v21, %v5999_v27  ;;  %v2215_v18 = vadd.f32 %v2214_v42, %v2213_v53  ;;  %v1895_v39 = vadd.f32 %v1499_v6, %v5175_v29  ;;  %v5371_v21 = vpop.f32.mrf.mxu1 }
 0x1a7   : > { %v1897_v52 = vadd.f32 %v1612_v41, %v5177_v30  ;;  %v6000_v9 = vrot.slane %v5217_v7, 1  ;;  %v5374_v55 = vsel %vm2359_vm15, %v2170_v22, %v2114_v31  ;;  %v2208_v57 = vadd.f32 %v2207_v58, %v2206_v2  ;;  %v5377_v10 = vpop.f32.mrf.mxu0 }
 0x1a8   : > { %v2221_v33 = vrot.slane %v2220_v4, 4  ;;  %v1896_v1 = vadd.f32 %v1501_v36, %v5181_v40  ;;  %v2202_v62 = vrot.slane %v2201_v8, 2  ;;  %v1903_v29 = vadd.f32 %v1503_v49, %v5193_v32  ;;  %v5385_v41 = vpop.f32.mrf.mxu1 }
 0x1a9   : > { %v5369_v0 = vmax.f32 %v5217_v7, %v6000_v9  ;;  %v6001_v30 = vrot.slane %v5240_v43, 1  ;;  %v210_v7 = vrot.slane %v209_v44, 1  ;;  %v2216_v50 = vrot.slane %v2215_v18, 2  ;;  %v5389_v40 = vpop.f32.mrf.mxu0 }
 0x1aa   : > { %v1905_v51 = vadd.f32 %v1616_v11, %v5195_v34  ;;  %v1904_v53 = vadd.f32 %v1505_v20, %v5200_v37  ;;  %v224_v48 = vrot.slane %v223_v26, 1  ;;  %v2209_v36 = vrot.slane %v2208_v57, 2  ;;  %v5400_v23 = vpop.f32.mrf.mxu1 }
 0x1ab   : > { %v5383_v6 = vmax.f32 %v5240_v43, %v6001_v30  ;;  %v2071_v32 = vsel %vm1975_vm14, %v1895_v39, 0.0  ;;  %v2073_v43 = vsel %vm1977_vm9, %v1897_v52, 0.0  ;;  %v2079_v49 = vsel %vm1983_vm11, %v1903_v29, 0.0  ;;  %v5408_v63 = vpop.f32.mrf.mxu0 }
 0x1ac   : > { %v2222_v34 = vadd.f32 %v2221_v33, %v2220_v4  ;;  %v2072_v37 = vsel %vm1976_vm5, %v1896_v1, 0.0  ;;  %v2255_v11 = vadd.f32 %v2079_v49, %v2071_v32  ;;  %v2081_v20 = vsel %vm1985_vm12, %v1905_v51, 0.0  ;;  %v5415_v4 = vpop.f32.mrf.mxu1 }
 0x1ad   : > { %v2203_v28 = vadd.f32 %v2202_v62, %v2201_v8  ;;  %v1898_v2 = vadd.f32 %v5326_v60, %v5185_v16  ;;  %v2269_v35 = vadd.f32 %v2081_v20, %v2073_v43  ;;  %v2080_v42 = vsel %vm1984_vm2, %v1904_v53, 0.0  ;;  %v5417_v22 = vpop.f32.mrf.mxu0  ;;  %v3267_v53 = vld [vmem:[%s3526_s22 + $0x10] sm:$0x77] }
 0x1ae   : > { %v2217_v59 = vadd.f32 %v2216_v50, %v2215_v18  ;;  %v2256_v27 = vrot.slane %v2255_v11, 4  ;;  %v2262_v31 = vadd.f32 %v2080_v42, %v2072_v37  ;;  %v2210_v38 = vadd.f32 %v2209_v36, %v2208_v57  ;;  %v5422_v60 = vpop.f32.mrf.mxu1 }
 0x1af   : > { %v2270_v58 = vrot.slane %v2269_v35, 4  ;;  %v5419_v8 = vmax.f32 %v209_v44, %v210_v7  ;;  %v1906_v16 = vadd.f32 %v1618_v61, %v5205_v45  ;;  %v2223_v39 = vrot.slane %v2222_v34, 2  ;;  %v5427_v18 = vpop.f32.mrf.mxu0 }
 0x1b0   : > { %vm254_vm7 = vcmp.lt.f32.partialorder %v5369_v0, 0.5  ;;  %v2257_v46 = vadd.f32 %v2256_v27, %v2255_v11  ;;  %v2263_v52 = vrot.slane %v2262_v31, 4  ;;  %v5425_v9 = vmax.f32 %v223_v26, %v224_v48  ;;  %v5436_v57 = vpop.f32.mrf.mxu1 }
 0x1b1   : > { %v2204_v33 = vrot.slane %v2203_v28, 1  ;;  %v2074_v44 = vsel %vm1978_vm3, %v1898_v2, 0.0  ;;  %vm256_vm10 = vcmp.lt.f32.partialorder %v5383_v6, 0.5  ;;  %v2271_v45 = vadd.f32 %v2270_v58, %v2269_v35  ;;  %v5438_v30 = vpop.f32.mrf.mxu0  ;;  %v3268_v35 = vld [vmem:[%s3526_s22 + $0x18] sm:$0x77] }
 0x1b2   : > { %v2082_v61 = vsel %vm1986_vm13, %v1906_v16, 0.0  ;;  %v2218_v1 = vrot.slane %v2217_v59, 1  ;;  %v2258_v26 = vrot.slane %v2257_v46, 2  ;;  %v2264_v62 = vadd.f32 %v2263_v52, %v2262_v31  ;;  %v5441_v51 = vpop.f32.mrf.mxu1 }
 0x1b3   : > { %v2276_v29 = vadd.f32 %v2082_v61, %v2074_v44  ;;  %v2211_v7 = vrot.slane %v2210_v38, 1  ;;  %v2272_v50 = vrot.slane %v2271_v45, 2  ;;  %vm255_vm6 = vcmp.lt.f32.partialorder %v5419_v8, 0.5  ;;  %v5444_v49 = vpop.f32.mrf.mxu0 }
 0x1b4   : > { %v183_v48 = vand.u32 2147483647, %v3267_v53  ;;  %v2224_v36 = vadd.f32 %v2223_v39, %v2222_v34  ;;  %v2259_v47 = vadd.f32 %v2258_v26, %v2257_v46  ;;  %v2265_v32 = vrot.slane %v2264_v62, 2  ;;  %v5446_v20 = vpop.f32.mrf.mxu1 }
 0x1b5   : > { %v2277_v43 = vrot.slane %v2276_v29, 4  ;;  %v2205_v37 = vadd.f32 %v2204_v33, %v2203_v28  ;;  %v2273_v11 = vadd.f32 %v2272_v50, %v2271_v45  ;;  %v1930_v2 = vrot.slane %v4013_v14, %v5165_v13  ;;  %v5451_v52 = vpop.f32.mrf.mxu0 }
 0x1b6   : > { %v184_v42 = vand.u32 2147483647, %v3268_v35  ;;  %v2219_v27 = vadd.f32 %v2218_v1, %v2217_v59  ;;  %v2260_v31 = vrot.slane %v2259_v47, 1  ;;  %v2266_v58 = vadd.f32 %v2265_v32, %v2264_v62  ;;  %v5454_v46 = vpop.f32.mrf.mxu1 }
 0x1b7   : > { %v2278_v16 = vadd.f32 %v2277_v43, %v2276_v29  ;;  %v2212_v34 = vadd.f32 %v2211_v7, %v2210_v38  ;;  %v2274_v39 = vrot.slane %v2273_v11, 1  ;;  %vm257_vm0 = vcmp.lt.f32.partialorder %v5425_v9, 0.5  ;;  %v5459_v1 = vpop.f32.mrf.mxu0 }
 0x1b8   : > { %v1938_v28 = vrot.slane %v4018_v19, %v5165_v13  ;;  %v226_v33 = vsel %vm197_vm1, %v183_v48, -inf  ;;  %v2225_v44 = vrot.slane %v2224_v36, 1  ;;  %v2261_v45 = vadd.f32 %v2260_v31, %v2259_v47  ;;  %v5463_v62 = vpop.f32.mrf.mxu1 }
 0x1b9   : > { %v2267_v61 = vrot.slane %v2266_v58, 1  ;;  %v2279_v59 = vrot.slane %v2278_v16, 2  ;;  %v2362_v26 = vsel %vm2361_vm4, %v2205_v37, %v5337_v17  ;;  %v2275_v38 = vadd.f32 %v2274_v39, %v2273_v11  ;;  %v5469_v43 = vpop.f32.mrf.mxu0 }
 0x1ba   : > { %v240_v29 = vsel %vm197_vm1, %v184_v42, -inf  ;;  %v191_v7 = vcombine.high %v183_v48, %v183_v48  ;;  %v2369_v50 = vsel %vm2361_vm4, %v2219_v27, %v5340_v25  ;;  %v2364_v53 = vsel %vm2363_vm8, %v2261_v45, %v2362_v26  ;;  %v5478_v11 = vpop.f32.mrf.mxu1 }
 0x1bb   : > { %v2268_v32 = vadd.f32 %v2267_v61, %v2266_v58  ;;  %v2280_v47 = vadd.f32 %v2279_v59, %v2278_v16  ;;  %v2366_v35 = vsel %vm2361_vm4, %v2212_v34, %v5349_v54  ;;  %v5475_v17 = vsel %vm254_vm7, %v2364_v53, 0.0  ;;  %v5486_v16 = vpop.f32.mrf.mxu0 }
 0x1bc   : > { %v2370_v37 = vsel %vm2363_vm8, %v2275_v38, %v2369_v50  ;;  %v192_v48 = vcombine.high %v184_v42, %v184_v42  ;;  %v2226_v31 = vadd.f32 %v2225_v44, %v2224_v36  ;;  %v3125_v25 = vmul.f32 -1.442695, %v5475_v17  ;;  %v5493_v39 = vpop.f32.mrf.mxu1 }
 0x1bd   : > { %v5483_v27 = vsel %vm256_vm10, %v2370_v37, 0.0  ;;  %v2367_v58 = vsel %vm2363_vm8, %v2268_v32, %v2366_v35  ;;  %v2281_v34 = vrot.slane %v2280_v47, 1  ;;  %v227_v36 = vrot.slane %v226_v33, 4  ;;  %v5495_v42 = vpop.f32.mrf.mxu0 }
 0x1be   : > { %v3127_v54 = vmul.f32 -1.442695, %v5483_v27  ;;  %v5491_v0 = vsel %vm255_vm6, %v2367_v58, 0.0  ;;  %v1934_v6 = vrot.slane %v4013_v14, %v5173_v24  ;;  %v1942_v44 = vrot.slane %v4018_v19, %v5173_v24  ;;  %v5503_v26 = vpop.f32.mrf.mxu1 }
 0x1bf   : > { %v241_v45 = vrot.slane %v240_v29, 4  ;;  %v233_v61 = vsel %vm197_vm1, %v191_v7, -inf  ;;  %3232 = vpow2.f32 %v3125_v25  ;;  %v3126_v8 = vmul.f32 -1.442695, %v5491_v0  ;;  %6002 = vst [vmem:[#allocation11_spill] sm:$0xff] %v5503_v26  ;;  %v5508_v53 = vpop.f32.mrf.mxu0 }
 0x1c0   : > { %v2282_v59 = vadd.f32 %v2281_v34, %v2280_v47  ;;  %v247_v38 = vsel %vm197_vm1, %v192_v48, -inf  ;;  %v2372_v50 = vsel %vm2361_vm4, %v2226_v31, %v5374_v55  ;;  %3234 = vpow2.f32 %v3127_v54  ;;  %v5511_v19 = vpop.f32.mrf.mxu1 }
 0x1c1   : > { %6003 = vst [vmem:[#allocation12_spill] sm:$0xff] %v5511_v19  ;;  %v5514_v24 = vrot.slane %v1930_v2, %v5165_v13  ;;  %v5517_v7 = vrot.slane %v1938_v28, %v5165_v13  ;;  %v228_v32 = vmax.f32 %v226_v33, %v227_v36  ;;  %v5523_v35 = vpop.f32.mrf.mxu0  ;;  %v242_v55 = vmax.f32 %v240_v29, %v241_v45 }
 0x1c2   : > { %v2373_v14 = vsel %vm2363_vm8, %v2282_v59, %v2372_v50  ;;  %6004 = vst [vmem:[#allocation13_spill] sm:$0xff] %v5523_v35  ;;  %v234_v37 = vrot.slane %v233_v61, 4  ;;  %v248_v48 = vrot.slane %v247_v38, 4  ;;  %3236 = vpow2.f32 %v3126_v8  ;;  %v5526_v25 = vpop.f32.mrf.mxu1 }
 0x1c3   : > { %v5521_v47 = vsel %vm257_vm0, %v2373_v14, 0.0  ;;  %6005 = vst [vmem:[#allocation14_spill] sm:$0xff] %v5526_v25  ;;  %v5529_v2 = vrot.slane %v1934_v6, %v5165_v13  ;;  %v5532_v28 = vrot.slane %v1942_v44, %v5165_v13  ;;  %v1695_v33 = vpop.f32.mrf.mxu0  ;;  %vm1979_vm1 = vcmp.eq.s32.totalorder %v3538_v12, %v5514_v24 }
 0x1c4   : > { %v3128_v31 = vmul.f32 -1.442695, %v5521_v47  ;;  %v1808_v9 = vpop.f32.mrf.mxu1  ;;  %v229_v58 = vrot.slane %v228_v32, 2  ;;  %v243_v54 = vrot.slane %v242_v55, 2  ;;  %v235_v34 = vmax.f32 %v233_v61, %v234_v37 }
 0x1c5   : > { %v1697_v29 = vpop.f32.mrf.mxu0  ;;  %v249_v36 = vmax.f32 %v247_v38, %v248_v48  ;;  %v1851_v45 = vadd.f32 %v1695_v33, %v5351_v3  ;;  %vm1981_vm14 = vcmp.eq.s32.totalorder %v3538_v12, %v5517_v7  ;;  %vm1980_vm9 = vcmp.eq.s32.totalorder %v3538_v12, %v5529_v2 }
 0x1c6   : > { %3238 = vpow2.f32 %v3128_v31  ;;  %v1810_v13 = vpop.f32.mrf.mxu1  ;;  %vm1982_vm5 = vcmp.eq.s32.totalorder %v3538_v12, %v5532_v28  ;;  %v1853_v6 = vadd.f32 %v1808_v9, %v5359_v15  ;;  %vm1987_vm3 = vcmp.eq.s32.totalorder %v3704_v56, %v5514_v24 }
 0x1c7   : > { %v1699_v44 = vpop.f32.mrf.mxu0  ;;  %vm1989_vm11 = vcmp.eq.s32.totalorder %v3704_v56, %v5517_v7  ;;  %vm1988_vm12 = vcmp.eq.s32.totalorder %v3704_v56, %v5529_v2  ;;  %v1852_v3 = vadd.f32 %v1697_v29, %v5362_v5  ;;  %vm1990_vm2 = vcmp.eq.s32.totalorder %v3704_v56, %v5532_v28 }
 0x1c8   : > { %v1859_v61 = vadd.f32 %v1699_v44, %v5377_v10  ;;  %v1812_v8 = vpop.f32.mrf.mxu1  ;;  %v230_v59 = vmax.f32 %v228_v32, %v229_v58  ;;  %v5555_v50 = vmax.f32 %v242_v55, %v243_v54  ;;  %v236_v14 = vrot.slane %v235_v34, 2 }
 0x1c9   : > { %v1861_v15 = vadd.f32 %v1812_v8, %v5385_v41  ;;  %v1701_v38 = vpop.f32.mrf.mxu0  ;;  %v250_v37 = vrot.slane %v249_v36, 2  ;;  %v2027_v48 = vsel %vm1979_vm1, %v1851_v45, 0.0  ;;  %v1854_v5 = vadd.f32 %v1810_v13, %v5371_v21 }
 0x1ca   : > { %v2035_v10 = vsel %vm1987_vm3, %v1859_v61, 0.0  ;;  %v1860_v31 = vadd.f32 %v1701_v38, %v5389_v40  ;;  %v1814_v32 = vpop.f32.mrf.mxu1  ;;  %v2029_v41 = vsel %vm1981_vm14, %v1853_v6, 0.0  ;;  %v2028_v54 = vsel %vm1980_vm9, %v1852_v3, 0.0 }
 0x1cb   : > { %v2115_v55 = vadd.f32 %v2035_v10, %v2027_v48  ;;  %v2037_v9 = vsel %vm1989_vm11, %v1861_v15, 0.0  ;;  %v1862_v58 = vadd.f32 %v1814_v32, %v5400_v23  ;;  %v1705_v21 = vpop.f32.mrf.mxu0  ;;  %v231_v6 = vrot.slane %v230_v59, 1 }
 0x1cc   : > { %v3233_v33 = vpop.eup %3232  ;;  %v2129_v40 = vadd.f32 %v2037_v9, %v2029_v41  ;;  %v2036_v45 = vsel %vm1988_vm12, %v1860_v31, 0.0  ;;  %v1818_v13 = vpop.f32.mrf.mxu1  ;;  %v5578_v38 = vmax.f32 %v235_v34, %v236_v14  ;;  %v5580_v15 = vmax.f32 %v249_v36, %v250_v37 }
 0x1cd   : > { %v3235_v29 = vpop.eup %3234  ;;  %v2116_v44 = vrot.slane %v2115_v55, 4  ;;  %v2122_v61 = vadd.f32 %v2036_v45, %v2028_v54  ;;  %v1707_v8 = vpop.f32.mrf.mxu0  ;;  %v2427_v23 = vadd.f32 1.0, %v3233_v33  ;;  %v2030_v48 = vsel %vm1982_vm5, %v1854_v5, 0.0 }
 0x1ce   : > { %v2130_v3 = vrot.slane %v2129_v40, 4  ;;  %v2038_v10 = vsel %vm1990_vm2, %v1862_v58, 0.0  ;;  %v1820_v31 = vpop.f32.mrf.mxu1  ;;  %v2429_v41 = vadd.f32 1.0, %v3235_v29  ;;  %v1867_v36 = vadd.f32 %v1705_v21, %v5408_v63 }
 0x1cf   : > { %v3237_v32 = vpop.eup %3236  ;;  %v2117_v9 = vadd.f32 %v2116_v44, %v2115_v55  ;;  %v2123_v54 = vrot.slane %v2122_v61, 4  ;;  %v2136_v45 = vadd.f32 %v2038_v10, %v2030_v48  ;;  %v1709_v34 = vpop.f32.mrf.mxu0  ;;  %v5590_v5 = vmax.f32 %v230_v59, %v231_v6 }
 0x1d0   : > { %v2131_v14 = vadd.f32 %v2130_v3, %v2129_v40  ;;  %v1822_v37 = vpop.f32.mrf.mxu1  ;;  %v1875_v33 = vadd.f32 %v1709_v34, %v5427_v18  ;;  %v245_v35 = vrot.slane %v5555_v50, 1  ;;  %v238_v58 = vrot.slane %v5578_v38, 1 }
 0x1d1   : > { %v1711_v25 = vpop.f32.mrf.mxu0  ;;  %6006 = vst [vmem:[#allocation15_spill] sm:$0xff] %v5590_v5  ;;  %3240 = vrcp.f32 %v2427_v23  ;;  %v2428_v29 = vadd.f32 1.0, %v3237_v32  ;;  %v2124_v55 = vadd.f32 %v2123_v54, %v2122_v61  ;;  %v252_v48 = vrot.slane %v5580_v15, 1 }
 0x1d2   : > { %v1824_v44 = vpop.f32.mrf.mxu1  ;;  %3242 = vrcp.f32 %v2429_v41  ;;  %v2118_v40 = vrot.slane %v2117_v9, 2  ;;  %v2137_v63 = vrot.slane %v2136_v45, 4  ;;  %v1869_v21 = vadd.f32 %v1818_v13, %v5415_v4 }
 0x1d3   : > { %v3239_v19 = vpop.eup %3238  ;;  %v1715_v18 = vpop.f32.mrf.mxu0  ;;  %v2132_v3 = vrot.slane %v2131_v14, 2  ;;  %v2043_v59 = vsel %vm1979_vm1, %v1867_v36, 0.0  ;;  %v2051_v6 = vsel %vm1987_vm3, %v1875_v33, 0.0  ;;  %v1877_v61 = vadd.f32 %v1822_v37, %v5436_v57 }
 0x1d4   : > { %v1828_v23 = vpop.f32.mrf.mxu1  ;;  %v2430_v10 = vadd.f32 1.0, %v3239_v19  ;;  %v1868_v32 = vadd.f32 %v1707_v8, %v5417_v22  ;;  %v1870_v41 = vadd.f32 %v1820_v31, %v5422_v60  ;;  %v2171_v54 = vadd.f32 %v2051_v6, %v2043_v59 }
 0x1d5   : > { %v1717_v4 = vpop.f32.mrf.mxu0  ;;  %v2125_v13 = vrot.slane %v2124_v55, 2  ;;  %v2053_v34 = vsel %vm1989_vm11, %v1877_v61, 0.0  ;;  %v1876_v36 = vadd.f32 %v1711_v25, %v5438_v30  ;;  %v1878_v5 = vadd.f32 %v1824_v44, %v5441_v51 }
 0x1d6   : > { %v1830_v33 = vpop.f32.mrf.mxu1  ;;  %v2119_v26 = vadd.f32 %v2118_v40, %v2117_v9  ;;  %v2138_v57 = vadd.f32 %v2137_v63, %v2136_v45  ;;  %v2045_v22 = vsel %vm1981_vm14, %v1869_v21, 0.0  ;;  %v2172_v19 = vrot.slane %v2171_v54, 4 }
 0x1d7   : > { %v1719_v60 = vpop.f32.mrf.mxu0  ;;  %3244 = vrcp.f32 %v2428_v29  ;;  %v2133_v8 = vadd.f32 %v2132_v3, %v2131_v14  ;;  %v2185_v31 = vadd.f32 %v2053_v34, %v2045_v22  ;;  %v2052_v37 = vsel %vm1988_vm12, %v1876_v36, 0.0 }
 0x1d8   : > { %v1832_v59 = vpop.f32.mrf.mxu1  ;;  %v2044_v30 = vsel %vm1980_vm9, %v1868_v32, 0.0  ;;  %v2173_v51 = vadd.f32 %v2172_v19, %v2171_v54  ;;  %v2054_v25 = vsel %vm1990_vm2, %v1878_v5, 0.0  ;;  %v5623_v9 = vmax.f32 %v5555_v50, %v245_v35 }
 0x1d9   : > { %v2126_v45 = vadd.f32 %v2125_v13, %v2124_v55  ;;  %v2178_v14 = vadd.f32 %v2052_v37, %v2044_v30  ;;  %v1721_v29 = vpop.f32.mrf.mxu0  ;;  %v5626_v44 = vmax.f32 %v5578_v38, %v238_v58  ;;  %v5629_v40 = vmax.f32 %v5580_v15, %v252_v48 }
 0x1da   : > { %vm2402_vm13 = vcmp.lt.s32.totalorder %v3538_v12, 3  ;;  %3246 = vrcp.f32 %v2430_v10  ;;  %v2120_v63 = vrot.slane %v2119_v26, 1  ;;  %v2139_v21 = vrot.slane %v2138_v57, 2  ;;  %v1834_v35 = vpop.f32.mrf.mxu1 }
 0x1db   : > { %v2046_v5 = vsel %vm1982_vm5, %v1870_v41, 0.0  ;;  %v2134_v50 = vrot.slane %v2133_v8, 1  ;;  %v2186_v55 = vrot.slane %v2185_v31, 4  ;;  %v1883_v6 = vadd.f32 %v1715_v18, %v5444_v49  ;;  %v1725_v41 = vpop.f32.mrf.mxu0 }
 0x1dc   : > { %v2192_v3 = vadd.f32 %v2054_v25, %v2046_v5  ;;  %v2451_v38 = vmax.f32 %v5475_v17, 0.0  ;;  %v2453_v15 = vmax.f32 %v5483_v27, 0.0  ;;  %v2452_v58 = vmax.f32 %v5491_v0, 0.0  ;;  %v1838_v27 = vpop.f32.mrf.mxu1 }
 0x1dd   : > { %v2174_v48 = vrot.slane %v2173_v51, 2  ;;  %v2454_v61 = vmax.f32 %v5521_v47, 0.0  ;;  %v2127_v10 = vrot.slane %v2126_v45, 1  ;;  %v2179_v32 = vrot.slane %v2178_v14, 4  ;;  %v1727_v37 = vpop.f32.mrf.mxu0 }
 0x1de   : > { %v1885_v54 = vadd.f32 %v1828_v23, %v5446_v20  ;;  %v3241_v13 = vpop.eup %3240  ;;  %v5641_v34 = vadd.f32 %v2120_v63, %v2119_v26  ;;  %v5643_v36 = vadd.f32 %v2139_v21, %v2138_v57  ;;  %v1891_v49 = vadd.f32 %v1719_v60, %v5459_v1 }
 0x1df   : > { %v1893_v17 = vadd.f32 %v1832_v59, %v5463_v62  ;;  %v3243_v18 = vpop.eup %3242  ;;  %v5647_v0 = vadd.f32 %v2134_v50, %v2133_v8  ;;  %v2187_v22 = vadd.f32 %v2186_v55, %v2185_v31  ;;  %v2193_v19 = vrot.slane %v2192_v3, 4 }
 0x1e0   : > { %v2059_v20 = vsel %vm1979_vm1, %v1883_v6, 0.0  ;;  %v2175_v23 = vadd.f32 %v2174_v48, %v2173_v51  ;;  %v1884_v26 = vadd.f32 %v1717_v4, %v5451_v52  ;;  %v2067_v57 = vsel %vm1987_vm3, %v1891_v49, 0.0  ;;  %v1840_v51 = vpop.f32.mrf.mxu1  ;;  %v1729_v6 = vpop.f32.mrf.mxu0 }
 0x1e1   : > { %v2069_v1 = vsel %vm1989_vm11, %v1893_v17, 0.0  ;;  %v5659_v62 = vadd.f32 %v2127_v10, %v2126_v45  ;;  %v2180_v60 = vadd.f32 %v2179_v32, %v2178_v14  ;;  %v2061_v8 = vsel %vm1981_vm14, %v1885_v54, 0.0 }
 0x1e2   : > { %v2227_v31 = vadd.f32 %v2067_v57, %v2059_v20  ;;  %v2141_v59 = vrot.slane %v5643_v36, 1  ;;  %v1886_v52 = vadd.f32 %v1830_v33, %v5454_v46  ;;  %v2241_v4 = vadd.f32 %v2069_v1, %v2061_v8  ;;  %v1842_v32 = vpop.f32.mrf.mxu1 }
 0x1e3   : > { %v1892_v30 = vadd.f32 %v1721_v29, %v5469_v43  ;;  %v2188_v25 = vrot.slane %v2187_v22, 2  ;;  %v2194_v63 = vadd.f32 %v2193_v19, %v2192_v3  ;;  %v1894_v45 = vadd.f32 %v1834_v35, %v5478_v11 }
 0x1e4   : > { %v2228_v21 = vrot.slane %v2227_v31, 4  ;;  %v3245_v14 = vpop.eup %3244  ;;  %v2176_v5 = vrot.slane %v2175_v23, 1  ;;  %v2060_v50 = vsel %vm1980_vm9, %v1884_v26, 0.0  ;;  %v2242_v55 = vrot.slane %v2241_v4, 4 }
 0x1e5   : > { %v2068_v46 = vsel %vm1988_vm12, %v1892_v30, 0.0  ;;  %v5676_v43 = vsel %vm2402_vm13, %v3241_v13, %v2451_v38  ;;  %v2181_v33 = vrot.slane %v2180_v60, 2  ;;  %v2062_v11 = vsel %vm1982_vm5, %v1886_v52, 0.0 }
 0x1e6   : > { %v2229_v29 = vadd.f32 %v2228_v21, %v2227_v31  ;;  %v2234_v3 = vadd.f32 %v2068_v46, %v2060_v50  ;;  %v2243_v35 = vadd.f32 %v2242_v55, %v2241_v4  ;;  %v2070_v48 = vsel %vm1990_vm2, %v1894_v45, 0.0  ;;  %v1731_v31 = vpop.f32.mrf.mxu0  ;;  %v6007_v4 = vld [vmem:[#allocation11_spill] sm:$0xff]  ;;  %v6009_v45 = vld [vmem:[#allocation13_spill] sm:$0xff] }
 0x1e7   : > { %v1899_v10 = vadd.f32 %v1725_v41, %v5486_v16  ;;  %v3247_v54 = vpop.eup %3246  ;;  %v5687_v38 = vsel %vm2402_vm13, %v3243_v18, %v2453_v15  ;;  %v2460_v13 = vsel %vm2402_vm13, %v3245_v14, %v2452_v58  ;;  %v2248_v17 = vadd.f32 %v2070_v48, %v2062_v11 }
 0x1e8   : > { %v2235_v49 = vrot.slane %v2234_v3, 4  ;;  %v5691_v19 = vadd.f32 %v2176_v5, %v2175_v23  ;;  %v5693_v20 = vadd.f32 %v2188_v25, %v2187_v22  ;;  %v2195_v26 = vrot.slane %v2194_v63, 2  ;;  %v1844_v23 = vpop.f32.mrf.mxu1 }
 0x1e9   : > { %v2230_v57 = vrot.slane %v2229_v29, 2  ;;  %v5695_v1 = vadd.f32 %v2181_v33, %v2180_v60  ;;  %v2249_v41 = vrot.slane %v2248_v17, 4  ;;  %v1907_v8 = vadd.f32 %v1729_v6, %v5508_v53  ;;  %v6011_v6 = vld [vmem:[#allocation15_spill] sm:$0xff] }
 0x1ea   : > { %v2236_v16 = vadd.f32 %v2235_v49, %v2234_v3  ;;  %v2462_v15 = vsel %vm2402_vm13, %v3247_v54, %v2454_v61  ;;  %v2244_v58 = vrot.slane %v2243_v35, 2  ;;  %v2075_v18 = vsel %vm1979_vm1, %v1899_v10, 0.0  ;;  %v6008_v61 = vld [vmem:[#allocation12_spill] sm:$0xff] }
 0x1eb   : > { %v1901_v22 = vadd.f32 %v1838_v27, %v5493_v39  ;;  %v2250_v60 = vadd.f32 %v2249_v41, %v2248_v17  ;;  %v1900_v52 = vadd.f32 %v1727_v37, %v5495_v42  ;;  %v1902_v30 = vadd.f32 %v1840_v51, %v6007_v4  ;;  %v6010_v39 = vld [vmem:[#allocation14_spill] sm:$0xff] }
 0x1ec   : > { %v2083_v53 = vsel %vm1987_vm3, %v1907_v8, 0.0  ;;  %v2231_v47 = vadd.f32 %v2230_v57, %v2229_v29  ;;  %v1909_v21 = vadd.f32 %v1842_v32, %v6008_v61  ;;  %v1908_v14 = vadd.f32 %v1731_v31, %v6009_v45 }
 0x1ed   : > { %v2283_v25 = vadd.f32 %v2083_v53, %v2075_v18  ;;  %v2196_v5 = vadd.f32 %v2195_v26, %v2194_v63  ;;  %v2237_v50 = vrot.slane %v2236_v16, 2  ;;  %v2251_v55 = vrot.slane %v2250_v60, 2 }
 0x1ee   : > { %v1910_v27 = vadd.f32 %v1844_v23, %v6010_v39  ;;  %v2077_v42 = vsel %vm1981_vm14, %v1901_v22, 0.0  ;;  %v2085_v24 = vsel %vm1989_vm11, %v1909_v21, 0.0  ;;  %v2084_v51 = vsel %vm1988_vm12, %v1908_v14, 0.0 }
 0x1ef   : > { %v2284_v37 = vrot.slane %v2283_v25, 4  ;;  %v2245_v46 = vadd.f32 %v2244_v58, %v2243_v35  ;;  %v2076_v63 = vsel %vm1980_vm9, %v1900_v52, 0.0  ;;  %v2078_v33 = vsel %vm1982_vm5, %v1902_v30, 0.0 }
 0x1f0   : > { %v2297_v29 = vadd.f32 %v2085_v24, %v2077_v42  ;;  %v2232_v3 = vrot.slane %v2231_v47, 1  ;;  %vm258_vm7 = vcmp.lt.f32.partialorder %v6011_v6, 0.5  ;;  %v2290_v7 = vadd.f32 %v2084_v51, %v2076_v63 }
 0x1f1   : > { %v2285_v11 = vadd.f32 %v2284_v37, %v2283_v25  ;;  %v2086_v48 = vsel %vm1990_vm2, %v1910_v27, 0.0  ;;  %v2238_v10 = vadd.f32 %v2237_v50, %v2236_v16  ;;  %v2252_v35 = vadd.f32 %v2251_v55, %v2250_v60 }
 0x1f2   : > { %v2298_v32 = vrot.slane %v2297_v29, 4  ;;  %v2304_v2 = vadd.f32 %v2086_v48, %v2078_v33  ;;  %v2291_v49 = vrot.slane %v2290_v7, 4  ;;  %v2475_v17 = vcombine.low %v5676_v43, %v2460_v13 }
 0x1f3   : > { %v2286_v54 = vrot.slane %v2285_v11, 2  ;;  %v2476_v26 = vcombine.low %v5687_v38, %v2462_v15  ;;  %v2190_v57 = vrot.slane %v5693_v20, 1  ;;  %v2183_v41 = vrot.slane %v5695_v1, 1 }
 0x1f4   : > { %vm260_vm10 = vcmp.lt.f32.partialorder %v5623_v9, 0.5  ;;  %v2299_v8 = vadd.f32 %v2298_v32, %v2297_v29  ;;  %v2305_v56 = vrot.slane %v2304_v2, 4  ;;  %v2197_v28 = vrot.slane %v2196_v5, 1  ;;  %2483 = vst [vmem:[%s5741_s15] sm:$0xff] %v2475_v17 }
 0x1f5   : > { %v2246_v16 = vrot.slane %v2245_v46, 1  ;;  %v2287_v31 = vadd.f32 %v2286_v54, %v2285_v11  ;;  %vm259_vm6 = vcmp.lt.f32.partialorder %v5626_v44, 0.5  ;;  %v2292_v58 = vadd.f32 %v2291_v49, %v2290_v7  ;;  %2484 = vst [vmem:[%s5741_s15 + $0x8] sm:$0xff] %v2476_v26 }
 0x1f6   : > { %v2233_v43 = vadd.f32 %v2232_v3, %v2231_v47  ;;  %v2239_v38 = vrot.slane %v2238_v10, 1  ;;  %v2300_v13 = vrot.slane %v2299_v8, 2  ;;  %vm261_vm0 = vcmp.lt.f32.partialorder %v5629_v40, 0.5 }
 0x1f7   : > { %v2306_v15 = vadd.f32 %v2305_v56, %v2304_v2  ;;  %v2374_v18 = vsel %vm2359_vm15, %v5691_v19, %v5641_v34  ;;  %v2253_v22 = vrot.slane %v2252_v35, 1  ;;  %v2288_v23 = vrot.slane %v2287_v31, 1 }
 0x1f8   : > { %v2293_v60 = vrot.slane %v2292_v58, 2  ;;  %v2191_v52 = vadd.f32 %v2190_v57, %v5693_v20  ;;  %v2184_v4 = vadd.f32 %v2183_v41, %v5695_v1  ;;  %v2301_v30 = vadd.f32 %v2300_v13, %v2299_v8 }
 0x1f9   : > { %v2307_v53 = vrot.slane %v2306_v15, 2  ;;  %v2198_v25 = vadd.f32 %v2197_v28, %v2196_v5  ;;  %v2247_v47 = vadd.f32 %v2246_v16, %v2245_v46  ;;  %v2289_v61 = vadd.f32 %v2288_v23, %v2287_v31 }
 0x1fa   : > { %v2294_v21 = vadd.f32 %v2293_v60, %v2292_v58  ;;  %v2375_v45 = vsel %vm2361_vm4, %v2233_v43, %v2374_v18  ;;  %v2240_v14 = vadd.f32 %v2239_v38, %v2238_v10  ;;  %v2302_v50 = vrot.slane %v2301_v30, 1 }
 0x1fb   : > { %v2308_v55 = vadd.f32 %v2307_v53, %v2306_v15  ;;  %v2142_v34 = vadd.f32 %v2141_v59, %v5643_v36  ;;  %v2254_v19 = vadd.f32 %v2253_v22, %v2252_v35  ;;  %v2376_v20 = vsel %vm2363_vm8, %v2289_v61, %v2375_v45 }
 0x1fc   : > { %v2295_v39 = vrot.slane %v2294_v21, 1  ;;  %v2380_v1 = vsel %vm2359_vm15, %v2191_v52, %v5647_v0  ;;  %v2398_v5 = vsel %vm258_vm7, %v2376_v20, 0.0  ;;  %v2303_v27 = vadd.f32 %v2302_v50, %v2301_v30 }
 0x1fd   : > { %v2309_v42 = vrot.slane %v2308_v55, 1  ;;  %v2377_v37 = vsel %vm2359_vm15, %v2184_v4, %v5659_v62  ;;  %v2381_v24 = vsel %vm2361_vm4, %v2247_v47, %v2380_v1  ;;  %v3129_v51 = vmul.f32 -1.442695, %v2398_v5 }
 0x1fe   : > { %v2296_v46 = vadd.f32 %v2295_v39, %v2294_v21  ;;  %v2383_v36 = vsel %vm2359_vm15, %v2198_v25, %v2142_v34  ;;  %v2378_v59 = vsel %vm2361_vm4, %v2240_v14, %v2377_v37  ;;  %v2382_v63 = vsel %vm2363_vm8, %v2303_v27, %v2381_v24 }
 0x1ff   : > { %v2310_v33 = vadd.f32 %v2309_v42, %v2308_v55  ;;  %v2384_v0 = vsel %vm2361_vm4, %v2254_v19, %v2383_v36  ;;  %3248 = vpow2.f32 %v3129_v51  ;;  %v2400_v29 = vsel %vm260_vm10, %v2382_v63, 0.0 }
 0x200   : > { %v2379_v3 = vsel %vm2363_vm8, %v2296_v46, %v2378_v59  ;;  %v3131_v62 = vmul.f32 -1.442695, %v2400_v29  ;;  %v2455_v57 = vmax.f32 %v2398_v5, 0.0  ;;  %v2457_v56 = vmax.f32 %v2400_v29, 0.0 }
 0x201   : > { %v2399_v6 = vsel %vm259_vm6, %v2379_v3, 0.0  ;;  %v2385_v11 = vsel %vm2363_vm8, %v2310_v33, %v2384_v0 }
 0x202   : > { %v3130_v7 = vmul.f32 -1.442695, %v2399_v6  ;;  %v2401_v48 = vsel %vm261_vm0, %v2385_v11, 0.0  ;;  %3250 = vpow2.f32 %v3131_v62  ;;  %v2456_v41 = vmax.f32 %v2399_v6, 0.0 }
 0x203   : > { %v3132_v10 = vmul.f32 -1.442695, %v2401_v48  ;;  %v2458_v28 = vmax.f32 %v2401_v48, 0.0 }
 0x204   : > { %3252 = vpow2.f32 %v3130_v7 }
 0x205   : > { %3254 = vpow2.f32 %v3132_v10 }
 0x20c   : > { %v3249_v35 = vpop.eup %3248 }
 0x20d   : > { %v2431_v32 = vadd.f32 1.0, %v3249_v35 }
 0x20f   : > { %v3251_v9 = vpop.eup %3250  ;;  %3256 = vrcp.f32 %v2431_v32 }
 0x210   : > { %v2433_v54 = vadd.f32 1.0, %v3251_v9 }
 0x211   : > { %v3253_v2 = vpop.eup %3252 }
 0x212   : > { %v3255_v49 = vpop.eup %3254  ;;  %v2432_v44 = vadd.f32 1.0, %v3253_v2  ;;  %3258 = vrcp.f32 %v2433_v54 }
 0x213   : > { %v2434_v17 = vadd.f32 1.0, %v3255_v49 }
 0x214   : > { %3260 = vrcp.f32 %v2432_v44 }
 0x215   : > { %3262 = vrcp.f32 %v2434_v17 }
 0x21c   : > { %v3257_v40 = vpop.eup %3256 }
 0x21d   : > { %v2463_v31 = vsel %vm2402_vm13, %v3257_v40, %v2455_v57 }
 0x21f   : > { %v3259_v26 = vpop.eup %3258 }
 0x220   : > { %v2465_v43 = vsel %vm2402_vm13, %v3259_v26, %v2457_v56 }
 0x221   : > { %v3261_v8 = vpop.eup %3260 }
 0x222   : > { %v3263_v16 = vpop.eup %3262  ;;  %v2464_v58 = vsel %vm2402_vm13, %v3261_v8, %v2456_v41 }
 0x223   : > { %v2466_v38 = vsel %vm2402_vm13, %v3263_v16, %v2458_v28  ;;  %v2477_v13 = vcombine.low %v2463_v31, %v2464_v58 }
 0x224   : > { %v2478_v15 = vcombine.low %v2465_v43, %v2466_v38 }
 0x225   : > { %2485 = vst [vmem:[%s5741_s15 + $0x10] sm:$0xff] %v2477_v13 }
 0x226   : > { %2486 = vst [vmem:[%s5741_s15 + $0x18] sm:$0xff] %v2478_v15 }
 0x227   : > { %3336 = shalt.err (!%p3333_p0)
}
 0x228   : > { %s3337_s27 = scalar_lea.hbm %s5788_s13, 512  ;;  %s3341_s4 = scalar_lea.hbm %s5828_s2, 4096 }
 0x229   : > { %p3338_p5 = scmp.ne.s32.totalorder %s5788_s13, %s3337_s27  ;;  %p3342_p1 = scmp.lt.s32.totalorder %s5788_s13, %s5828_s2 }
 0x22a   : > { %p3343_p4 = scmp.lt.s32.totalorder %s3341_s4, %s3337_s27 }
 0x22b   : > { %p3339_p9 = pnand %p3338_p5, %p6012_p3 }
 0x22c   : > { %p3344_p6 = por %p3343_p4, %p3342_p1 }
 0x22d   : > { %p3340_p11 = pneg %p3339_p9 }
 0x22f   : > { %p3345_p8 = pnand %p3344_p6, %p3340_p11 }
 0x231   : > { %3348 = shalt.err (!%p3345_p8)
}
 0x232   : > { %3154 = dma.vmem_to_hbm [thread:$0]  (%p6012_p3), %s2503_s8, 512, %s5788_s13, %s2488_s20  }
 0x233 PF: > { %p3171_p10 = scmp.ge.s32.totalorder %s3391_s12, 2  ;;  %s2514_s7 = sand.u32 1, %s3379_s9  }
 0x234   : > { %p6013_p7 = scmp.ne.s32.totalorder %s5835_s16, 0  ;;  %s2515_s14 = scalar_lea.sflag [#allocation4], %s2514_s7 }
 0x236   : > { %p3165_p12 = pnand %p3171_p10, %p6013_p7 }
 0x238   : > { %p3166_p2 = pneg %p3165_p12 }
 0x23a   : > { %3374 = dma.done.wait (%p3166_p2), %s2515_s14, 512  }
 0x23b   : > { %3376 = vsyncadd (%p3166_p2), %s2515_s14, 4294966784  ;;  %p16_p13 = scmp.ge.s32.totalorder %s3467_s21, 10   ;;  %s6014_s9 = smov %s3383_s10 }
 0x23c   : > { %s6015_s10 = smov %s3387_s11  ;;  %s6016_s11 = smov %s3484_s29 }
 0x23d   : > { %s6017_s12 = smov %s3467_s21  ;;  %18 = sbr.rel (!%p16_p13) target bundleno = 6 (0x6), region = 77 }
 0x242   :  { %2520 = vsyncpa [#allocation3], 1 }
 0x243   :  { %2522 = vsyncpa [#allocation3 + $0x1], 1 }
 0x244   :  { %2523 = vsyncpa [#allocation6], 1 }
 0x245   :  { %2524 = vsyncpa [#allocation4], 1 }
 0x246   :  { %2526 = vsyncpa [#allocation4 + $0x1], 1 }

</bundles_post_ra>
